<compile_context>
chip_gen: v7x
topology: tpu7x:2x2x1
jax: 0.10.0
libtpu: 0.0.40
codegen_flags: <defaults>
</compile_context>

<pallas_src>
import functools

import jax
import jax.numpy as jnp
import numpy as np
from jax.experimental import pallas as pl
from jax.experimental.pallas import tpu as pltpu

D_MODEL = 256
OUTPUT_DIM = 3
OUT_PAD = 128            # lane-dense output head (cols 3..127 carry zero weights)
CLASS_SIZE = 5
CLASS_PAD = 8            # one-hot / embedding-projection rows padded to 8
EMBED_DIM = 50
IN_FLAT = 10 * 10        # flattened image features
K_PAD = 128              # fused projection K: 100 image + 8 one-hot + 20 zero pad
N_RES_LAYERS = 7
TM_MAX = 512             # max batch tile (MXU M dimension)
SUB_ALIGN = 16           # bf16 sublane packing -> keep batch tiles 16-row aligned


def _round_up(x, m):
    return (x + m - 1) // m * m


def _device_kind():
    try:
        return jax.devices()[0].device_kind.lower()
    except Exception:
        return ""


def _use_bf16_stream():
    # bf16 VALU is native on v6e / v7x; keep f32 stream elsewhere (v5e & older).
    kind = _device_kind()
    return ("v6" in kind) or ("v7" in kind) or ("7x" in kind)


def _is_multi_tc():
    # v7x has 2 TensorCores per chip -> want >= 2 grid blocks for mid batches.
    kind = _device_kind()
    return ("v7" in kind) or ("7x" in kind)


def mlp_resnet_kernel(x_ref, wp_ref, wl_ref, bl_ref, wo_ref, bo_ref, o_ref,
                      *, bf16_stream):
    # x_ref:  (TM, 128) bf16   -- [image(100) | one-hot label(8) | zeros(20)]
    # wp_ref: (128, 256) bf16  -- [wp_x ; E@wp_e + bp (padded to 8 rows) ; zeros]
    # wl_ref: (7, 256, 256) bf16    bl_ref: (7, 1, 256) f32
    # wo_ref: (256, 128) bf16       bo_ref: (1, 128) f32
    # o_ref:  (TM, 128) f32
    act = jnp.bfloat16 if bf16_stream else jnp.float32

    # Fused projection + embedding lookup + projection bias (single MXU pass).
    h = jnp.dot(x_ref[...], wp_ref[...], preferred_element_type=act)   # (TM, 256)
    h = jnp.maximum(h, 0.0)

    bl = bl_ref[...].astype(act)                                       # (7, 1, 256)

    # 7 residual blocks: a = x; x = relu(linear(x)); (dropout = identity); x += a
    for i in range(N_RES_LAYERS):
        a = h
        d = jnp.dot(h.astype(jnp.bfloat16), wl_ref[i],
                    preferred_element_type=act)                        # f32 MXU acc
        h = jnp.maximum(d + bl[i], 0.0) + a
        # TODO(synk): dropout(p=0.05) treated as identity (inference forward).

    # Output head (lane-dense, padded to 128 cols) + ReLU, stored as f32.
    y = jnp.dot(h.astype(jnp.bfloat16), wo_ref[...],
                preferred_element_type=jnp.float32) + bo_ref[...]
    o_ref[...] = jnp.maximum(y, 0.0)


def init_params(key):
    """f32 master parameters mimicking nn.Linear / nn.Embedding shapes."""
    ks = jax.random.split(key, 2 + 2 * N_RES_LAYERS + 2 + 1)
    idx = 0

    def uniform(k, shape, fan_in):
        bound = 1.0 / jnp.sqrt(fan_in)
        return jax.random.uniform(k, shape, jnp.float32, -bound, bound)

    in_features = IN_FLAT + EMBED_DIM
    wp = uniform(ks[idx], (in_features, D_MODEL), in_features); idx += 1
    bp = uniform(ks[idx], (1, D_MODEL), in_features); idx += 1

    wl_list, bl_list = [], []
    for _ in range(N_RES_LAYERS):
        wl_list.append(uniform(ks[idx], (D_MODEL, D_MODEL), D_MODEL)); idx += 1
        bl_list.append(uniform(ks[idx], (1, D_MODEL), D_MODEL)); idx += 1
    wl = jnp.stack(wl_list, axis=0)           # (7, 256, 256)
    bl = jnp.stack(bl_list, axis=0)           # (7, 1, 256)

    wo = uniform(ks[idx], (D_MODEL, OUTPUT_DIM), D_MODEL); idx += 1
    bo = uniform(ks[idx], (1, OUTPUT_DIM), D_MODEL); idx += 1

    embedding = jax.random.normal(ks[idx], (CLASS_SIZE, EMBED_DIM), jnp.float32)

    return dict(wp=wp, bp=bp, wl=wl, bl=bl, wo=wo, bo=bo, embedding=embedding)


def pack_params(p):
    """One-time conversion of f32 master params into kernel-ready operands."""
    wp_x = p["wp"][:IN_FLAT]                                         # (100, 256)
    wp_e = p["wp"][IN_FLAT:]                                         # (50, 256)
    emb_proj = p["embedding"] @ wp_e + p["bp"]                       # (5, 256) incl. bias
    emb_proj = jnp.pad(emb_proj, ((0, CLASS_PAD - CLASS_SIZE), (0, 0)))  # (8, 256)
    zpad = jnp.zeros((K_PAD - IN_FLAT - CLASS_PAD, D_MODEL), jnp.float32)
    wp_full = jnp.concatenate([wp_x, emb_proj, zpad], axis=0).astype(jnp.bfloat16)

    wl = p["wl"].astype(jnp.bfloat16)                                # (7, 256, 256)
    bl = p["bl"].astype(jnp.float32)                                 # (7, 1, 256)
    wo = jnp.pad(p["wo"], ((0, 0), (0, OUT_PAD - OUTPUT_DIM))).astype(jnp.bfloat16)
    bo = jnp.pad(p["bo"], ((0, 0), (0, OUT_PAD - OUTPUT_DIM))).astype(jnp.float32)
    return dict(wp_full=wp_full, wl=wl, bl=bl, wo=wo, bo=bo)


def _choose_tiling(batch, multi_tc):
    b_min = _round_up(max(batch, SUB_ALIGN), SUB_ALIGN)
    min_blocks = 2 if (multi_tc and batch >= 16) else 1
    tm = min(TM_MAX, _round_up(-(-b_min // min_blocks), SUB_ALIGN))
    b_pad = _round_up(b_min, tm)
    return tm, b_pad


def mlp_2_10_resnet_class_forward(x, label, kparams):
    """x: (B, 10, 10) f32, label: (B,) int -> (weight, offset_1, offset_2)."""
    B = x.shape[0]
    bf16_stream = _use_bf16_stream()
    tm, b_pad = _choose_tiling(B, _is_multi_tc())
    n_blocks = b_pad // tm

    # Pack [image | one-hot label | zero pad] in bf16 (the MXU input dtype).
    x_flat = x.reshape(B, IN_FLAT).astype(jnp.float32)
    one_hot = (label.reshape(B, 1).astype(jnp.int32) ==
               jnp.arange(CLASS_PAD, dtype=jnp.int32)[None, :]).astype(jnp.float32)
    zpad = jnp.zeros((B, K_PAD - IN_FLAT - CLASS_PAD), jnp.float32)
    x_packed = jnp.concatenate([x_flat, one_hot, zpad], axis=1).astype(jnp.bfloat16)
    # Padded batch rows are all-zero (no one-hot/bias); they are sliced off below.
    x_packed = jnp.pad(x_packed, ((0, b_pad - B), (0, 0)))

    kernel = functools.partial(mlp_resnet_kernel, bf16_stream=bf16_stream)

    out = pl.pallas_call(
        kernel,
        out_shape=jax.ShapeDtypeStruct((b_pad, OUT_PAD), jnp.float32),
        grid=(n_blocks,),
        in_specs=[
            pl.BlockSpec((tm, K_PAD), lambda i: (i, 0)),                          # x
            pl.BlockSpec((K_PAD, D_MODEL), lambda i: (0, 0)),                     # wp_full
            pl.BlockSpec((N_RES_LAYERS, D_MODEL, D_MODEL), lambda i: (0, 0, 0)),  # wl
            pl.BlockSpec((N_RES_LAYERS, 1, D_MODEL), lambda i: (0, 0, 0)),        # bl
            pl.BlockSpec((D_MODEL, OUT_PAD), lambda i: (0, 0)),                   # wo
            pl.BlockSpec((1, OUT_PAD), lambda i: (0, 0)),                         # bo
        ],
        out_specs=pl.BlockSpec((tm, OUT_PAD), lambda i: (i, 0)),
        compiler_params=pltpu.CompilerParams(
            dimension_semantics=("parallel",),
            vmem_limit_bytes=32 * 1024 * 1024,
        ),
    )(x_packed, kparams["wp_full"], kparams["wl"], kparams["bl"],
      kparams["wo"], kparams["bo"])

    out = out[:B, :OUTPUT_DIM]
    return out[:, 0], out[:, 1], out[:, 2]


def reference_forward(x, label, p):
    """Pure-JAX f32 reference mirroring the torch module (eval mode)."""
    B = x.shape[0]
    emb = p["embedding"][label]
    h = jnp.concatenate([x.reshape(B, -1), emb], axis=1)
    h = jnp.maximum(h @ p["wp"] + p["bp"], 0.0)
    for i in range(N_RES_LAYERS):
        a = h
        h = jnp.maximum(h @ p["wl"][i] + p["bl"][i], 0.0)
        h = h + a
    y = jnp.maximum(h @ p["wo"] + p["bo"], 0.0)
    return y[:, 0], y[:, 1], y[:, 2]


def _check(outs, refs, batch):
    for o, r in zip(outs, refs):
        assert o.shape == (batch,)
        # bf16 weights (+ bf16 activation stream on v6e/v7x) -> loose tolerance.
        np.testing.assert_allclose(np.asarray(o), np.asarray(r), rtol=2e-1, atol=1e-1)


if __name__ == "__main__":
    key = jax.random.PRNGKey(0)
    k_params, k_x, k_label, k_x2, k_label2 = jax.random.split(key, 5)

    params = init_params(k_params)
    kernel_params = pack_params(params)

    # Case 1: tiny batch (single block).
    batch = 2
    x = jax.random.normal(k_x, (batch, 10, 10), jnp.float32)
    label = jax.random.randint(k_label, (batch,), 0, CLASS_SIZE, jnp.int32)
    outs = mlp_2_10_resnet_class_forward(x, label, kernel_params)
    jax.block_until_ready(outs)
    _check(outs, reference_forward(x, label, params), batch)

    # Case 2: larger batch (exercises the multi-block / padded-batch path).
    batch2 = 24
    x2 = jax.random.normal(k_x2, (batch2, 10, 10), jnp.float32)
    label2 = jax.random.randint(k_label2, (batch2,), 0, CLASS_SIZE, jnp.int32)
    outs2 = mlp_2_10_resnet_class_forward(x2, label2, kernel_params)
    jax.block_until_ready(outs2)
    _check(outs2, reference_forward(x2, label2, params), batch2)

    print("KERNEL_OK")
</pallas_src>

<mosaic_0001>
module attributes {stable_mosaic.version = 11 : i64} {
  func.func @mlp_resnet_kernel(%arg0: i32, %arg1: memref<16x128xbf16, #tpu.memory_space<vmem>>, %arg2: memref<128x256xbf16, #tpu.memory_space<vmem>>, %arg3: memref<7x256x256xbf16, #tpu.memory_space<vmem>>, %arg4: memref<7x1x256xf32, #tpu.memory_space<vmem>>, %arg5: memref<256x128xbf16, #tpu.memory_space<vmem>>, %arg6: memref<1x128xf32, #tpu.memory_space<vmem>>, %arg7: memref<16x128xf32, #tpu.memory_space<vmem>>) attributes {dimension_semantics = [#tpu.dimension_semantics<parallel>], iteration_bounds = array<i64: 1>, scalar_prefetch = 0 : i64, scratch_operands = 0 : i64, tpu.core_type = #tpu.core_type<tc>, window_params = [{transform_indices = @transform_0, window_bounds = array<i64: 16, 128>}, {pipeline_mode = #tpu.pipeline_mode<synchronous>, transform_indices = @transform_1, window_bounds = array<i64: 128, 256>}, {pipeline_mode = #tpu.pipeline_mode<synchronous>, transform_indices = @transform_2, window_bounds = array<i64: 7, 256, 256>}, {pipeline_mode = #tpu.pipeline_mode<synchronous>, transform_indices = @transform_3, window_bounds = array<i64: 7, 1, 256>}, {pipeline_mode = #tpu.pipeline_mode<synchronous>, transform_indices = @transform_4, window_bounds = array<i64: 256, 128>}, {pipeline_mode = #tpu.pipeline_mode<synchronous>, transform_indices = @transform_5, window_bounds = array<i64: 1, 128>}, {transform_indices = @transform_6, window_bounds = array<i64: 16, 128>}]} {
    %c0 = arith.constant 0 : index
    %c0_0 = arith.constant 0 : index
    %0 = vector.load %arg1[%c0, %c0_0] : memref<16x128xbf16, #tpu.memory_space<vmem>>, vector<16x128xbf16>
    %c0_1 = arith.constant 0 : index
    %c0_2 = arith.constant 0 : index
    %1 = vector.load %arg2[%c0_1, %c0_2] : memref<128x256xbf16, #tpu.memory_space<vmem>>, vector<128x256xbf16>
    %cst = arith.constant dense<0.000000e+00> : vector<16x256xf32>
    %2 = tpu.matmul %0, %1, %cst {dimension_numbers = #tpu.dot_dimension_numbers<[1], [0], [0], [1], [0, 0, 1, 1], [], []>} : vector<16x128xbf16>, vector<128x256xbf16>, vector<16x256xf32> -> vector<16x256xf32>
    %cst_3 = arith.constant 0.000000e+00 : f32
    %3 = vector.broadcast %cst_3 : f32 to vector<16x256xf32>
    %4 = arith.maximumf %2, %3 : vector<16x256xf32>
    %c0_4 = arith.constant 0 : index
    %c0_5 = arith.constant 0 : index
    %c0_6 = arith.constant 0 : index
    %5 = vector.load %arg4[%c0_4, %c0_5, %c0_6] : memref<7x1x256xf32, #tpu.memory_space<vmem>>, vector<7x1x256xf32>
    %6 = arith.truncf %4 : vector<16x256xf32> to vector<16x256xbf16>
    %c0_7 = arith.constant 0 : index
    %c0_8 = arith.constant 0 : index
    %c0_9 = arith.constant 0 : index
    %7 = vector.load %arg3[%c0_7, %c0_8, %c0_9] : memref<7x256x256xbf16, #tpu.memory_space<vmem>>, vector<1x256x256xbf16>
    %8 = vector.shape_cast %7 : vector<1x256x256xbf16> to vector<256x256xbf16>
    %cst_10 = arith.constant dense<0.000000e+00> : vector<16x256xf32>
    %9 = tpu.matmul %6, %8, %cst_10 {dimension_numbers = #tpu.dot_dimension_numbers<[1], [0], [0], [1], [0, 0, 1, 1], [], []>} : vector<16x256xbf16>, vector<256x256xbf16>, vector<16x256xf32> -> vector<16x256xf32>
    %10 = vector.extract_strided_slice %5 {offsets = [0, 0, 0], sizes = [1, 1, 256], strides = [1, 1, 1]} : vector<7x1x256xf32> to vector<1x1x256xf32>
    %11 = vector.shape_cast %10 : vector<1x1x256xf32> to vector<1x256xf32>
    %12 = vector.broadcast %11 : vector<1x256xf32> to vector<16x256xf32>
    %13 = arith.addf %9, %12 : vector<16x256xf32>
    %cst_11 = arith.constant 0.000000e+00 : f32
    %14 = vector.broadcast %cst_11 : f32 to vector<16x256xf32>
    %15 = arith.maximumf %13, %14 : vector<16x256xf32>
    %16 = arith.addf %15, %4 : vector<16x256xf32>
    %17 = arith.truncf %16 : vector<16x256xf32> to vector<16x256xbf16>
    %c1 = arith.constant 1 : index
    %c0_12 = arith.constant 0 : index
    %c0_13 = arith.constant 0 : index
    %18 = vector.load %arg3[%c1, %c0_12, %c0_13] : memref<7x256x256xbf16, #tpu.memory_space<vmem>>, vector<1x256x256xbf16>
    %19 = vector.shape_cast %18 : vector<1x256x256xbf16> to vector<256x256xbf16>
    %cst_14 = arith.constant dense<0.000000e+00> : vector<16x256xf32>
    %20 = tpu.matmul %17, %19, %cst_14 {dimension_numbers = #tpu.dot_dimension_numbers<[1], [0], [0], [1], [0, 0, 1, 1], [], []>} : vector<16x256xbf16>, vector<256x256xbf16>, vector<16x256xf32> -> vector<16x256xf32>
    %21 = vector.extract_strided_slice %5 {offsets = [1, 0, 0], sizes = [1, 1, 256], strides = [1, 1, 1]} : vector<7x1x256xf32> to vector<1x1x256xf32>
    %22 = vector.shape_cast %21 : vector<1x1x256xf32> to vector<1x256xf32>
    %23 = vector.broadcast %22 : vector<1x256xf32> to vector<16x256xf32>
    %24 = arith.addf %20, %23 : vector<16x256xf32>
    %cst_15 = arith.constant 0.000000e+00 : f32
    %25 = vector.broadcast %cst_15 : f32 to vector<16x256xf32>
    %26 = arith.maximumf %24, %25 : vector<16x256xf32>
    %27 = arith.addf %26, %16 : vector<16x256xf32>
    %28 = arith.truncf %27 : vector<16x256xf32> to vector<16x256xbf16>
    %c2 = arith.constant 2 : index
    %c0_16 = arith.constant 0 : index
    %c0_17 = arith.constant 0 : index
    %29 = vector.load %arg3[%c2, %c0_16, %c0_17] : memref<7x256x256xbf16, #tpu.memory_space<vmem>>, vector<1x256x256xbf16>
    %30 = vector.shape_cast %29 : vector<1x256x256xbf16> to vector<256x256xbf16>
    %cst_18 = arith.constant dense<0.000000e+00> : vector<16x256xf32>
    %31 = tpu.matmul %28, %30, %cst_18 {dimension_numbers = #tpu.dot_dimension_numbers<[1], [0], [0], [1], [0, 0, 1, 1], [], []>} : vector<16x256xbf16>, vector<256x256xbf16>, vector<16x256xf32> -> vector<16x256xf32>
    %32 = vector.extract_strided_slice %5 {offsets = [2, 0, 0], sizes = [1, 1, 256], strides = [1, 1, 1]} : vector<7x1x256xf32> to vector<1x1x256xf32>
    %33 = vector.shape_cast %32 : vector<1x1x256xf32> to vector<1x256xf32>
    %34 = vector.broadcast %33 : vector<1x256xf32> to vector<16x256xf32>
    %35 = arith.addf %31, %34 : vector<16x256xf32>
    %cst_19 = arith.constant 0.000000e+00 : f32
    %36 = vector.broadcast %cst_19 : f32 to vector<16x256xf32>
    %37 = arith.maximumf %35, %36 : vector<16x256xf32>
    %38 = arith.addf %37, %27 : vector<16x256xf32>
    %39 = arith.truncf %38 : vector<16x256xf32> to vector<16x256xbf16>
    %c3 = arith.constant 3 : index
    %c0_20 = arith.constant 0 : index
    %c0_21 = arith.constant 0 : index
    %40 = vector.load %arg3[%c3, %c0_20, %c0_21] : memref<7x256x256xbf16, #tpu.memory_space<vmem>>, vector<1x256x256xbf16>
    %41 = vector.shape_cast %40 : vector<1x256x256xbf16> to vector<256x256xbf16>
    %cst_22 = arith.constant dense<0.000000e+00> : vector<16x256xf32>
    %42 = tpu.matmul %39, %41, %cst_22 {dimension_numbers = #tpu.dot_dimension_numbers<[1], [0], [0], [1], [0, 0, 1, 1], [], []>} : vector<16x256xbf16>, vector<256x256xbf16>, vector<16x256xf32> -> vector<16x256xf32>
    %43 = vector.extract_strided_slice %5 {offsets = [3, 0, 0], sizes = [1, 1, 256], strides = [1, 1, 1]} : vector<7x1x256xf32> to vector<1x1x256xf32>
    %44 = vector.shape_cast %43 : vector<1x1x256xf32> to vector<1x256xf32>
    %45 = vector.broadcast %44 : vector<1x256xf32> to vector<16x256xf32>
    %46 = arith.addf %42, %45 : vector<16x256xf32>
    %cst_23 = arith.constant 0.000000e+00 : f32
    %47 = vector.broadcast %cst_23 : f32 to vector<16x256xf32>
    %48 = arith.maximumf %46, %47 : vector<16x256xf32>
    %49 = arith.addf %48, %38 : vector<16x256xf32>
    %50 = arith.truncf %49 : vector<16x256xf32> to vector<16x256xbf16>
    %c4 = arith.constant 4 : index
    %c0_24 = arith.constant 0 : index
    %c0_25 = arith.constant 0 : index
    %51 = vector.load %arg3[%c4, %c0_24, %c0_25] : memref<7x256x256xbf16, #tpu.memory_space<vmem>>, vector<1x256x256xbf16>
    %52 = vector.shape_cast %51 : vector<1x256x256xbf16> to vector<256x256xbf16>
    %cst_26 = arith.constant dense<0.000000e+00> : vector<16x256xf32>
    %53 = tpu.matmul %50, %52, %cst_26 {dimension_numbers = #tpu.dot_dimension_numbers<[1], [0], [0], [1], [0, 0, 1, 1], [], []>} : vector<16x256xbf16>, vector<256x256xbf16>, vector<16x256xf32> -> vector<16x256xf32>
    %54 = vector.extract_strided_slice %5 {offsets = [4, 0, 0], sizes = [1, 1, 256], strides = [1, 1, 1]} : vector<7x1x256xf32> to vector<1x1x256xf32>
    %55 = vector.shape_cast %54 : vector<1x1x256xf32> to vector<1x256xf32>
    %56 = vector.broadcast %55 : vector<1x256xf32> to vector<16x256xf32>
    %57 = arith.addf %53, %56 : vector<16x256xf32>
    %cst_27 = arith.constant 0.000000e+00 : f32
    %58 = vector.broadcast %cst_27 : f32 to vector<16x256xf32>
    %59 = arith.maximumf %57, %58 : vector<16x256xf32>
    %60 = arith.addf %59, %49 : vector<16x256xf32>
    %61 = arith.truncf %60 : vector<16x256xf32> to vector<16x256xbf16>
    %c5 = arith.constant 5 : index
    %c0_28 = arith.constant 0 : index
    %c0_29 = arith.constant 0 : index
    %62 = vector.load %arg3[%c5, %c0_28, %c0_29] : memref<7x256x256xbf16, #tpu.memory_space<vmem>>, vector<1x256x256xbf16>
    %63 = vector.shape_cast %62 : vector<1x256x256xbf16> to vector<256x256xbf16>
    %cst_30 = arith.constant dense<0.000000e+00> : vector<16x256xf32>
    %64 = tpu.matmul %61, %63, %cst_30 {dimension_numbers = #tpu.dot_dimension_numbers<[1], [0], [0], [1], [0, 0, 1, 1], [], []>} : vector<16x256xbf16>, vector<256x256xbf16>, vector<16x256xf32> -> vector<16x256xf32>
    %65 = vector.extract_strided_slice %5 {offsets = [5, 0, 0], sizes = [1, 1, 256], strides = [1, 1, 1]} : vector<7x1x256xf32> to vector<1x1x256xf32>
    %66 = vector.shape_cast %65 : vector<1x1x256xf32> to vector<1x256xf32>
    %67 = vector.broadcast %66 : vector<1x256xf32> to vector<16x256xf32>
    %68 = arith.addf %64, %67 : vector<16x256xf32>
    %cst_31 = arith.constant 0.000000e+00 : f32
    %69 = vector.broadcast %cst_31 : f32 to vector<16x256xf32>
    %70 = arith.maximumf %68, %69 : vector<16x256xf32>
    %71 = arith.addf %70, %60 : vector<16x256xf32>
    %72 = arith.truncf %71 : vector<16x256xf32> to vector<16x256xbf16>
    %c6 = arith.constant 6 : index
    %c0_32 = arith.constant 0 : index
    %c0_33 = arith.constant 0 : index
    %73 = vector.load %arg3[%c6, %c0_32, %c0_33] : memref<7x256x256xbf16, #tpu.memory_space<vmem>>, vector<1x256x256xbf16>
    %74 = vector.shape_cast %73 : vector<1x256x256xbf16> to vector<256x256xbf16>
    %cst_34 = arith.constant dense<0.000000e+00> : vector<16x256xf32>
    %75 = tpu.matmul %72, %74, %cst_34 {dimension_numbers = #tpu.dot_dimension_numbers<[1], [0], [0], [1], [0, 0, 1, 1], [], []>} : vector<16x256xbf16>, vector<256x256xbf16>, vector<16x256xf32> -> vector<16x256xf32>
    %76 = vector.extract_strided_slice %5 {offsets = [6, 0, 0], sizes = [1, 1, 256], strides = [1, 1, 1]} : vector<7x1x256xf32> to vector<1x1x256xf32>
    %77 = vector.shape_cast %76 : vector<1x1x256xf32> to vector<1x256xf32>
    %78 = vector.broadcast %77 : vector<1x256xf32> to vector<16x256xf32>
    %79 = arith.addf %75, %78 : vector<16x256xf32>
    %cst_35 = arith.constant 0.000000e+00 : f32
    %80 = vector.broadcast %cst_35 : f32 to vector<16x256xf32>
    %81 = arith.maximumf %79, %80 : vector<16x256xf32>
    %82 = arith.addf %81, %71 : vector<16x256xf32>
    %83 = arith.truncf %82 : vector<16x256xf32> to vector<16x256xbf16>
    %c0_36 = arith.constant 0 : index
    %c0_37 = arith.constant 0 : index
    %84 = vector.load %arg5[%c0_36, %c0_37] : memref<256x128xbf16, #tpu.memory_space<vmem>>, vector<256x128xbf16>
    %cst_38 = arith.constant dense<0.000000e+00> : vector<16x128xf32>
    %85 = tpu.matmul %83, %84, %cst_38 {dimension_numbers = #tpu.dot_dimension_numbers<[1], [0], [0], [1], [0, 0, 1, 1], [], []>} : vector<16x256xbf16>, vector<256x128xbf16>, vector<16x128xf32> -> vector<16x128xf32>
    %c0_39 = arith.constant 0 : index
    %c0_40 = arith.constant 0 : index
    %86 = vector.load %arg6[%c0_39, %c0_40] : memref<1x128xf32, #tpu.memory_space<vmem>>, vector<1x128xf32>
    %87 = vector.broadcast %86 : vector<1x128xf32> to vector<16x128xf32>
    %88 = arith.addf %85, %87 : vector<16x128xf32>
    %cst_41 = arith.constant 0.000000e+00 : f32
    %89 = vector.broadcast %cst_41 : f32 to vector<16x128xf32>
    %90 = arith.maximumf %88, %89 : vector<16x128xf32>
    %c0_42 = arith.constant 0 : index
    %c0_43 = arith.constant 0 : index
    %91 = vector.load %arg7[%c0_42, %c0_43] : memref<16x128xf32, #tpu.memory_space<vmem>>, vector<16x128xf32>
    tpu.vector_store %arg7[%c0_42, %c0_43], %90 {strides = array<i32>} : memref<16x128xf32, #tpu.memory_space<vmem>>, vector<16x128xf32>,
    return
  }
  func.func @transform_0(%arg0: i32) -> (i32, i32) {
    %c0_i32 = arith.constant 0 : i32
    %c0_i32_0 = arith.constant 0 : i32
    return %arg0, %c0_i32 : i32, i32
  }
  func.func @transform_1(%arg0: i32) -> (i32, i32) {
    %c0_i32 = arith.constant 0 : i32
    %c0_i32_0 = arith.constant 0 : i32
    %c0_i32_1 = arith.constant 0 : i32
    return %c0_i32, %c0_i32_0 : i32, i32
  }
  func.func @transform_2(%arg0: i32) -> (i32, i32, i32) {
    %c0_i32 = arith.constant 0 : i32
    %c0_i32_0 = arith.constant 0 : i32
    %c0_i32_1 = arith.constant 0 : i32
    %c0_i32_2 = arith.constant 0 : i32
    return %c0_i32, %c0_i32_0, %c0_i32_1 : i32, i32, i32
  }
  func.func @transform_3(%arg0: i32) -> (i32, i32, i32) {
    %c0_i32 = arith.constant 0 : i32
    %c0_i32_0 = arith.constant 0 : i32
    %c0_i32_1 = arith.constant 0 : i32
    %c0_i32_2 = arith.constant 0 : i32
    return %c0_i32, %c0_i32_0, %c0_i32_1 : i32, i32, i32
  }
  func.func @transform_4(%arg0: i32) -> (i32, i32) {
    %c0_i32 = arith.constant 0 : i32
    %c0_i32_0 = arith.constant 0 : i32
    %c0_i32_1 = arith.constant 0 : i32
    return %c0_i32, %c0_i32_0 : i32, i32
  }
  func.func @transform_5(%arg0: i32) -> (i32, i32) {
    %c0_i32 = arith.constant 0 : i32
    %c0_i32_0 = arith.constant 0 : i32
    %c0_i32_1 = arith.constant 0 : i32
    return %c0_i32, %c0_i32_0 : i32, i32
  }
  func.func @transform_6(%arg0: i32) -> (i32, i32) {
    %c0_i32 = arith.constant 0 : i32
    %c0_i32_0 = arith.constant 0 : i32
    return %arg0, %c0_i32 : i32, i32
  }
}

</mosaic_0001>

<bundles_post_ra>
// kernel: tpu_custom_call.1
= control target key start
LH: loop header
LB: loop body
LE: loop exit
PB: predicated region body
PF: predicated region fallthrough
CT: control target
= control target key end

     0   :  { %11 = vsyncpa [#allocation3], 0  ;;  %s3308_s0 = inlined_call_operand.hbm [shape: bf16[16,128], index: 0, kind: input, shape index: {}]   ;;  %s3309_s1 = inlined_call_operand.hbm [shape: bf16[128,256], index: 1, kind: input, shape index: {}]   ;;  %s3310_s2 = inlined_call_operand.hbm [shape: bf16[7,256,256], index: 2, kind: input, shape index: {}]   ;;  %s3311_s3 = inlined_call_operand.hbm [shape: f32[7,1,256], index: 3, kind: input, shape index: {}]   ;;  %s3312_s4 = inlined_call_operand.hbm [shape: bf16[256,128], index: 4, kind: input, shape index: {}]   ;;  %s3313_s5 = inlined_call_operand.vmem [shape: f32[1,128], index: 5, kind: input, shape index: {}]   ;;  %s3314_s6 = inlined_call_operand.hbm [shape: f32[16,128], index: 6, kind: output, shape index: {}]  }
   0x1   :  { %12 = vsyncpa [#allocation6], 0 }
   0x2   :  { %13 = vsyncpa [#allocation9], 0 }
   0x3   :  { %14 = vsyncpa [#allocation4], 0  ;;  %s3060_s21 = smov [#allocation5]   ;;  %s2920_s25 = scalar_lea.hbm %s3309_s1, 2048 }
   0x4   :  { %s32_s22 = sshll.u32 %s3060_s21, 4  ;;  %p2921_p0 = scmp.ne.s32.totalorder %s3309_s1, %s2920_s25  ;;  %s33_s22 = int_to_ptr.vmem [resolvable:$true] %s32_s22 }
   0x5   :  { %p2924_p1 = scmp.lt.u32.totalorder %s2920_s25, %s3309_s1 }
   0x7   :  { %p2926_p2 = pnand %p2924_p1, %p2921_p0 }
   0x9   :  { %2929 = shalt.err (!%p2926_p2)
}
   0xa   :  { %s2930_s30 = scalar_lea.vmem %s33_s22, 2048  ;;  %p2935_p4 = scmp.lt.s32.totalorder %s33_s22, %s33_s22 }
   0xb   :  { %p2931_p3 = scmp.ne.s32.totalorder %s33_s22, %s2930_s30  ;;  %p2936_p5 = scmp.lt.s32.totalorder %s2930_s30, %s2930_s30 }
   0xd   :  { %p2937_p6 = por %p2936_p5, %p2935_p4 }
   0xf   :  { %p2938_p7 = pnand %p2937_p6, %p2931_p3 }
  0x11   :  { %2941 = shalt.err (!%p2938_p7)
}
  0x12   :  { %s3061_s7 = smov 128   ;;  %s3062_s8 = smov 8  }
  0x13   :  { %38 = dma.hbm_to_vmem [thread:$0]  %s3309_s1, 2048, %s33_s22, [#allocation6], %s3061_s7, %s3061_s7, %s3062_s8  }
  0x14   :  { %s3063_s11 = smov [#allocation8]   ;;  %s2942_s15 = scalar_lea.hbm %s3311_s3, 224 }
  0x15   :  { %s56_s12 = sshll.u32 %s3063_s11, 4  ;;  %p2943_p8 = scmp.ne.s32.totalorder %s3311_s3, %s2942_s15  ;;  %s57_s12 = int_to_ptr.vmem [resolvable:$true] %s56_s12 }
  0x16   :  { %p2946_p9 = scmp.lt.u32.totalorder %s2942_s15, %s3311_s3 }
  0x18   :  { %p2948_p10 = pnand %p2946_p9, %p2943_p8 }
  0x1a   :  { %2951 = shalt.err (!%p2948_p10)
}
  0x1b   :  { %s2952_s20 = scalar_lea.vmem %s57_s12, 224  ;;  %p2957_p12 = scmp.lt.s32.totalorder %s57_s12, %s57_s12 }
  0x1c   :  { %p2953_p11 = scmp.ne.s32.totalorder %s57_s12, %s2952_s20  ;;  %p2958_p13 = scmp.lt.s32.totalorder %s2952_s20, %s2952_s20 }
  0x1e   :  { %p2959_p0 = por %p2958_p13, %p2957_p12 }
  0x20   :  { %p2960_p1 = pnand %p2959_p0, %p2953_p11 }
  0x22   :  { %2963 = shalt.err (!%p2960_p1)
}
  0x23   :  { %s3064_s1 = smov 32   ;;  %s3065_s21 = smov 2  }
  0x24   :  { %62 = dma.hbm_to_vmem [thread:$0]  %s3311_s3, 224, %s57_s12, [#allocation9], %s3064_s1, %s3064_s1, %s3065_s21  }
  0x25   :  { %s3066_s24 = smov [#allocation2]   ;;  %s2964_s28 = scalar_lea.hbm %s3308_s0, 128 }
  0x26   :  { %s20_s25 = sshll.u32 %s3066_s24, 4  ;;  %p2965_p2 = scmp.ne.s32.totalorder %s3308_s0, %s2964_s28  ;;  %s21_s25 = int_to_ptr.vmem [resolvable:$true] %s20_s25 }
  0x27   :  { %p2968_p3 = scmp.lt.u32.totalorder %s2964_s28, %s3308_s0 }
  0x29   :  { %p2970_p4 = pnand %p2968_p3, %p2965_p2 }
  0x2b   :  { %2973 = shalt.err (!%p2970_p4)
}
  0x2c   :  { %s2974_s11 = scalar_lea.vmem %s21_s25, 128  ;;  %p2979_p6 = scmp.lt.s32.totalorder %s21_s25, %s21_s25 }
  0x2d   :  { %p2975_p5 = scmp.ne.s32.totalorder %s21_s25, %s2974_s11  ;;  %p2980_p7 = scmp.lt.s32.totalorder %s2974_s11, %s2974_s11 }
  0x2f   :  { %p2981_p8 = por %p2980_p7, %p2979_p6 }
  0x31   :  { %p2982_p9 = pnand %p2981_p8, %p2975_p5 }
  0x33   :  { %2985 = shalt.err (!%p2982_p9)
}
  0x34   :  { %s3067_s3 = smov 64   ;;  %s3068_s12 = smov 4  }
  0x35   :  { %26 = dma.hbm_to_vmem [thread:$0]  %s3308_s0, 128, %s21_s25, [#allocation3], %s3067_s3, %s3067_s3, %s3068_s12  }
  0x36   :  { %s3069_s15 = smov [#allocation7]   ;;  %s3070_s17 = smov [#allocation10]  }
  0x37   :  { %s44_s16 = sshll.u32 %s3069_s15, 4  ;;  %s68_s18 = sshll.u32 %s3070_s17, 4  ;;  %s45_s16 = int_to_ptr.vmem [resolvable:$true] %s44_s16  ;;  %s69_s18 = int_to_ptr.vmem [resolvable:$true] %s68_s18 }
  0x38   :  { %s2986_s1 = scalar_lea.hbm %s3310_s2, 28672 }
  0x39   :  { %p2987_p10 = scmp.ne.s32.totalorder %s3310_s2, %s2986_s1  ;;  %p2990_p11 = scmp.lt.u32.totalorder %s2986_s1, %s3310_s2 }
  0x3b   :  { %p2992_p12 = pnand %p2990_p11, %p2987_p10 }
  0x3d   :  { %2995 = shalt.err (!%p2992_p12)
}
  0x3e   :  { %s2996_s0 = scalar_lea.vmem %s45_s16, 28672  ;;  %p3001_p0 = scmp.lt.s32.totalorder %s45_s16, %s45_s16 }
  0x3f   :  { %p2997_p13 = scmp.ne.s32.totalorder %s45_s16, %s2996_s0  ;;  %p3002_p1 = scmp.lt.s32.totalorder %s2996_s0, %s2996_s0 }
  0x41   :  { %p3003_p2 = por %p3002_p1, %p3001_p0 }
  0x43   :  { %p3004_p3 = pnand %p3003_p2, %p2997_p13 }
  0x45   :  { %3007 = shalt.err (!%p3004_p3)
}
  0x46   :  { %50 = dma.hbm_to_vmem [thread:$0]  %s3310_s2, 28672, %s45_s16, [#allocation6], %s3061_s7, %s3061_s7, %s3062_s8  }
  0x47   :  { %s3008_s29 = scalar_lea.hbm %s3312_s4, 2048 }
  0x48   :  { %p3009_p4 = scmp.ne.s32.totalorder %s3312_s4, %s3008_s29  ;;  %p3012_p5 = scmp.lt.u32.totalorder %s3008_s29, %s3312_s4 }
  0x4a   :  { %p3014_p6 = pnand %p3012_p5, %p3009_p4 }
  0x4c   :  { %3017 = shalt.err (!%p3014_p6)
}
  0x4d   :  { %s3018_s13 = scalar_lea.vmem %s69_s18, 2048  ;;  %p3023_p8 = scmp.lt.s32.totalorder %s69_s18, %s69_s18 }
  0x4e   :  { %p3019_p7 = scmp.ne.s32.totalorder %s69_s18, %s3018_s13  ;;  %p3024_p9 = scmp.lt.s32.totalorder %s3018_s13, %s3018_s13 }
  0x50   :  { %p3025_p10 = por %p3024_p9, %p3023_p8 }
  0x52   :  { %p3026_p11 = pnand %p3025_p10, %p3019_p7 }
  0x54   :  { %3029 = shalt.err (!%p3026_p11)
}
  0x55   :  { %74 = dma.hbm_to_vmem [thread:$0]  %s3312_s4, 2048, %s69_s18, [#allocation9], %s3067_s3, %s3067_s3, %s3068_s12  }
  0x56   :  { %3052 = dma.done.wait [#allocation3], 128  }
  0x57   :  { %3053 = vsyncadd [#allocation3], 4294967168 }
  0x58   :  { %3054 = dma.done.wait [#allocation6], 30720  }
  0x59   :  { %3055 = vsyncadd [#allocation6], 4294936576 }
  0x5a   :  { %3056 = dma.done.wait [#allocation9], 2272  }
  0x5b   :  { %3057 = vsyncadd [#allocation9], 4294965024  ;;  %v3071_v0 = vmov 0   ;;  %v2543_v1 = vld [vmem:[#allocation5 + $0x4] ss:$8 sps:$4 sm:$0xff]   ;;  %v2567_v27 = vld [vmem:[#allocation2] sm:$0xff]  }
  0x5c   :  { %229 = vmatprep.mubr.bf16.mxu0 %v3071_v0  ;;  %v2545_v2 = vld [vmem:[#allocation5] ss:$8 sps:$4 sm:$0xff]   ;;  %197 = vmatprep.subr.bf16.mxu0 %v2543_v1  ;;  %v2546_v3 = vld [vmem:[#allocation5 + $0x14] ss:$8 sps:$4 sm:$0xff]   ;;  %v2548_v4 = vld [vmem:[#allocation5 + $0x10] ss:$8 sps:$4 sm:$0xff]  }
  0x5d   :  { %198 = vmatpush1.bf16.msra.mxu0 %v2545_v2  ;;  %v2549_v5 = vld [vmem:[#allocation5 + $0x24] ss:$8 sps:$4 sm:$0xff]   ;;  %v2551_v6 = vld [vmem:[#allocation5 + $0x20] ss:$8 sps:$4 sm:$0xff]   ;;  %v2552_v7 = vld [vmem:[#allocation5 + $0x34] ss:$8 sps:$4 sm:$0xff]  }
  0x5e   :  { %199 = vmatprep.subr.bf16.mxu0 %v2546_v3  ;;  %v2554_v8 = vld [vmem:[#allocation5 + $0x30] ss:$8 sps:$4 sm:$0xff]   ;;  %v2555_v9 = vld [vmem:[#allocation5 + $0x44] ss:$8 sps:$4 sm:$0xff]   ;;  %v2570_v11 = vld [vmem:[#allocation7] ss:$8 sps:$4 sm:$0xff]  }
  0x5f   :  { %v2568_v10 = vld [vmem:[#allocation7 + $0x4] ss:$8 sps:$4 sm:$0xff]   ;;  %v2571_v12 = vld [vmem:[#allocation7 + $0x14] ss:$8 sps:$4 sm:$0xff]   ;;  %v2557_v13 = vld [vmem:[#allocation5 + $0x40] ss:$8 sps:$4 sm:$0xff]  }
  0x60   :  { %456 = vmatprep.subr.bf16.mxu1 %v2568_v10  ;;  %v2573_v14 = vld [vmem:[#allocation7 + $0x10] ss:$8 sps:$4 sm:$0xff]   ;;  %v2558_v15 = vld [vmem:[#allocation5 + $0x54] ss:$8 sps:$4 sm:$0xff]   ;;  %v2574_v16 = vld [vmem:[#allocation7 + $0x24] ss:$8 sps:$4 sm:$0xff]  }
  0x61   :  { %200 = vmatpush1.bf16.msra.mxu0 %v2548_v4  ;;  %457 = vmatpush1.bf16.msra.mxu1 %v2570_v11  ;;  %v2560_v17 = vld [vmem:[#allocation5 + $0x50] ss:$8 sps:$4 sm:$0xff]   ;;  %v2576_v18 = vld [vmem:[#allocation7 + $0x20] ss:$8 sps:$4 sm:$0xff]   ;;  %v2561_v19 = vld [vmem:[#allocation5 + $0x64] ss:$8 sps:$4 sm:$0xff]  }
  0x62   :  { %201 = vmatprep.subr.bf16.mxu0 %v2549_v5  ;;  %458 = vmatprep.subr.bf16.mxu1 %v2571_v12  ;;  %v2577_v20 = vld [vmem:[#allocation7 + $0x34] ss:$8 sps:$4 sm:$0xff]   ;;  %v2563_v21 = vld [vmem:[#allocation5 + $0x60] ss:$8 sps:$4 sm:$0xff]   ;;  %v2579_v22 = vld [vmem:[#allocation7 + $0x30] ss:$8 sps:$4 sm:$0xff]  }
  0x63   :  { %v2564_v23 = vld [vmem:[#allocation5 + $0x74] ss:$8 sps:$4 sm:$0xff]   ;;  %v2580_v24 = vld [vmem:[#allocation7 + $0x44] ss:$8 sps:$4 sm:$0xff]   ;;  %v2566_v25 = vld [vmem:[#allocation5 + $0x70] ss:$8 sps:$4 sm:$0xff]  }
  0x64   :  { %v2582_v26 = vld [vmem:[#allocation7 + $0x40] ss:$8 sps:$4 sm:$0xff]   ;;  %v2583_v28 = vld [vmem:[#allocation7 + $0x54] ss:$8 sps:$4 sm:$0xff]   ;;  %v2585_v29 = vld [vmem:[#allocation7 + $0x50] ss:$8 sps:$4 sm:$0xff]  }
  0x65   :  { %202 = vmatpush1.bf16.msra.mxu0 %v2551_v6  ;;  %459 = vmatpush1.bf16.msra.mxu1 %v2573_v14  ;;  %v2586_v30 = vld [vmem:[#allocation7 + $0x64] ss:$8 sps:$4 sm:$0xff]   ;;  %v2588_v31 = vld [vmem:[#allocation7 + $0x60] ss:$8 sps:$4 sm:$0xff]   ;;  %v2589_v32 = vld [vmem:[#allocation7 + $0x74] ss:$8 sps:$4 sm:$0xff]  }
  0x66   :  { %203 = vmatprep.subr.bf16.mxu0 %v2552_v7  ;;  %460 = vmatprep.subr.bf16.mxu1 %v2574_v16  ;;  %v2591_v33 = vld [vmem:[#allocation7 + $0x70] ss:$8 sps:$4 sm:$0xff]   ;;  %v2592_v34 = vld [vmem:[#allocation7 + $0x84] ss:$8 sps:$4 sm:$0xff]   ;;  %v2594_v35 = vld [vmem:[#allocation7 + $0x80] ss:$8 sps:$4 sm:$0xff]  }
  0x67   :  { %v2595_v36 = vld [vmem:[#allocation7 + $0x94] ss:$8 sps:$4 sm:$0xff]   ;;  %v2597_v37 = vld [vmem:[#allocation7 + $0x90] ss:$8 sps:$4 sm:$0xff]   ;;  %v2598_v38 = vld [vmem:[#allocation7 + $0xa4] ss:$8 sps:$4 sm:$0xff]  }
  0x68   :  { %v2600_v39 = vld [vmem:[#allocation7 + $0xa0] ss:$8 sps:$4 sm:$0xff]   ;;  %v2601_v40 = vld [vmem:[#allocation7 + $0xb4] ss:$8 sps:$4 sm:$0xff]   ;;  %v2603_v41 = vld [vmem:[#allocation7 + $0xb0] ss:$8 sps:$4 sm:$0xff]  }
  0x69   :  { %204 = vmatpush1.bf16.msra.mxu0 %v2554_v8  ;;  %461 = vmatpush1.bf16.msra.mxu1 %v2576_v18  ;;  %v2604_v42 = vld [vmem:[#allocation7 + $0xc4] ss:$8 sps:$4 sm:$0xff]   ;;  %v2606_v43 = vld [vmem:[#allocation7 + $0xc0] ss:$8 sps:$4 sm:$0xff]   ;;  %v2607_v44 = vld [vmem:[#allocation7 + $0xd4] ss:$8 sps:$4 sm:$0xff]  }
  0x6a   :  { %205 = vmatprep.subr.bf16.mxu0 %v2555_v9  ;;  %462 = vmatprep.subr.bf16.mxu1 %v2577_v20  ;;  %v2609_v45 = vld [vmem:[#allocation7 + $0xd0] ss:$8 sps:$4 sm:$0xff]   ;;  %v2610_v46 = vld [vmem:[#allocation7 + $0xe4] ss:$8 sps:$4 sm:$0xff]   ;;  %v2612_v47 = vld [vmem:[#allocation7 + $0xe0] ss:$8 sps:$4 sm:$0xff]  }
  0x6b   :  { %v2613_v48 = vld [vmem:[#allocation7 + $0xf4] ss:$8 sps:$4 sm:$0xff]   ;;  %v2615_v49 = vld [vmem:[#allocation7 + $0xf0] ss:$8 sps:$4 sm:$0xff]   ;;  %v2616_v50 = vld [vmem:[#allocation7 + $0x100] ss:$8 sps:$4 sm:$0xff]  }
  0x6c   :  { %v2618_v51 = vld [vmem:[#allocation7 + $0x104] ss:$8 sps:$4 sm:$0xff]   ;;  %v2621_v52 = vld [vmem:[#allocation7 + $0x114] ss:$8 sps:$4 sm:$0xff]   ;;  %v2619_v53 = vld [vmem:[#allocation7 + $0x110] ss:$8 sps:$4 sm:$0xff]  }
  0x6d   :  { %206 = vmatpush1.bf16.msra.mxu0 %v2557_v13  ;;  %463 = vmatpush1.bf16.msra.mxu1 %v2579_v22  ;;  %v2624_v54 = vld [vmem:[#allocation7 + $0x124] ss:$8 sps:$4 sm:$0xff]   ;;  %v2622_v55 = vld [vmem:[#allocation7 + $0x120] ss:$8 sps:$4 sm:$0xff]   ;;  %v2627_v56 = vld [vmem:[#allocation7 + $0x134] ss:$8 sps:$4 sm:$0xff]  }
  0x6e   :  { %207 = vmatprep.subr.bf16.mxu0 %v2558_v15  ;;  %464 = vmatprep.subr.bf16.mxu1 %v2580_v24  ;;  %v2625_v57 = vld [vmem:[#allocation7 + $0x130] ss:$8 sps:$4 sm:$0xff]   ;;  %v2630_v58 = vld [vmem:[#allocation7 + $0x144] ss:$8 sps:$4 sm:$0xff]   ;;  %v2628_v59 = vld [vmem:[#allocation7 + $0x140] ss:$8 sps:$4 sm:$0xff]  }
  0x6f   :  { %v2633_v60 = vld [vmem:[#allocation7 + $0x154] ss:$8 sps:$4 sm:$0xff]   ;;  %v2631_v61 = vld [vmem:[#allocation7 + $0x150] ss:$8 sps:$4 sm:$0xff]   ;;  %v2636_v62 = vld [vmem:[#allocation7 + $0x164] ss:$8 sps:$4 sm:$0xff]  }
  0x70   :  { %v2634_v63 = vld [vmem:[#allocation7 + $0x160] ss:$8 sps:$4 sm:$0xff]   ;;  %v2639_v0 = vld [vmem:[#allocation7 + $0x174] ss:$8 sps:$4 sm:$0xff]   ;;  %v2637_v1 = vld [vmem:[#allocation7 + $0x170] ss:$8 sps:$4 sm:$0xff]  }
  0x71   :  { %208 = vmatpush1.bf16.msra.mxu0 %v2560_v17  ;;  %465 = vmatpush1.bf16.msra.mxu1 %v2582_v26  ;;  %v2642_v2 = vld [vmem:[#allocation7 + $0x184] ss:$8 sps:$4 sm:$0xff]   ;;  %v2640_v3 = vld [vmem:[#allocation7 + $0x180] ss:$8 sps:$4 sm:$0xff]   ;;  %v2645_v4 = vld [vmem:[#allocation7 + $0x194] ss:$8 sps:$4 sm:$0xff]  }
  0x72   :  { %209 = vmatprep.subr.bf16.mxu0 %v2561_v19  ;;  %466 = vmatprep.subr.bf16.mxu1 %v2583_v28  ;;  %v2643_v5 = vld [vmem:[#allocation7 + $0x190] ss:$8 sps:$4 sm:$0xff]   ;;  %v2648_v6 = vld [vmem:[#allocation7 + $0x1a4] ss:$8 sps:$4 sm:$0xff]   ;;  %v2646_v7 = vld [vmem:[#allocation7 + $0x1a0] ss:$8 sps:$4 sm:$0xff]  }
  0x73   :  { %v2651_v8 = vld [vmem:[#allocation7 + $0x1b4] ss:$8 sps:$4 sm:$0xff]   ;;  %v2649_v9 = vld [vmem:[#allocation7 + $0x1b0] ss:$8 sps:$4 sm:$0xff]   ;;  %v2654_v10 = vld [vmem:[#allocation7 + $0x1c4] ss:$8 sps:$4 sm:$0xff]  }
  0x74   :  { %v2652_v11 = vld [vmem:[#allocation7 + $0x1c0] ss:$8 sps:$4 sm:$0xff]   ;;  %v2657_v22 = vld [vmem:[#allocation7 + $0x1d4] ss:$8 sps:$4 sm:$0xff]   ;;  %v2660_v24 = vld [vmem:[#allocation7 + $0x1e4] ss:$8 sps:$4 sm:$0xff]  }
  0x75   :  { %210 = vmatpush1.bf16.msra.mxu0 %v2563_v21  ;;  %467 = vmatpush1.bf16.msra.mxu1 %v2585_v29  ;;  %v2663_v26 = vld [vmem:[#allocation7 + $0x1f4] ss:$8 sps:$4 sm:$0xff]   ;;  %v2664_v28 = vld [vmem:[#allocation7 + $0x200] ss:$8 sps:$4 sm:$0xff]   ;;  %v2666_v29 = vld [vmem:[#allocation7 + $0x204] ss:$8 sps:$4 sm:$0xff]  }
  0x76   :  { %211 = vmatprep.subr.bf16.mxu0 %v2564_v23  ;;  %468 = vmatprep.subr.bf16.mxu1 %v2586_v30  ;;  %v2655_v23 = vld [vmem:[#allocation7 + $0x1d0] ss:$8 sps:$4 sm:$0xff]   ;;  %v2669_v30 = vld [vmem:[#allocation7 + $0x214] ss:$8 sps:$4 sm:$0xff]   ;;  %s3072_s12 = smov [#allocation11]  }
  0x77   :  { %s2236_s15 = sshll.u32 %s3072_s12, 4  ;;  %s2237_s15 = int_to_ptr.vmem [resolvable:$true] %s2236_s15 }
  0x78   :  { %s3030_s16 = scalar_lea.vmem %s2237_s15, 256  ;;  %p3035_p13 = scmp.lt.s32.totalorder %s2237_s15, %s2237_s15 }
  0x79   :  { %212 = vmatpush1.bf16.msra.mxu0 %v2566_v25  ;;  %469 = vmatpush1.bf16.msra.mxu1 %v2588_v31  ;;  %v2658_v25 = vld [vmem:[#allocation7 + $0x1e0] ss:$8 sps:$4 sm:$0xff]   ;;  %v2667_v31 = vld [vmem:[#allocation7 + $0x210] ss:$8 sps:$4 sm:$0xff]   ;;  %p3031_p12 = scmp.ne.s32.totalorder %s2237_s15, %s3030_s16  ;;  %p3036_p0 = scmp.lt.s32.totalorder %s3030_s16, %s3030_s16 }
  0x7a   :  { %470 = vmatprep.subr.bf16.mxu1 %v2589_v32  ;;  %713 = vmatprep.subr.bf16.mxu0 %v2618_v51  ;;  %v2672_v32 = vld [vmem:[#allocation7 + $0x224] ss:$8 sps:$4 sm:$0xff]   ;;  %v2697_v51 = vld [vmem:[#allocation7 + $0x2b0] ss:$8 sps:$4 sm:$0xff]  }
  0x7b   :  { %p3037_p1 = por %p3036_p0, %p3035_p13 }
  0x7c   :  { %230 = vmatmul.mubr.bf16.vlgmr.msra.gmra.mrb[0].mxu0 %v2567_v27  ;;  %v2661_v27 = vld [vmem:[#allocation7 + $0x1f0] ss:$8 sps:$4 sm:$0xff]  }
  0x7d   :  { %471 = vmatpush1.bf16.msra.mxu1 %v2591_v33  ;;  %714 = vmatpush1.bf16.msra.mxu0 %v2616_v50  ;;  %v2670_v33 = vld [vmem:[#allocation7 + $0x220] ss:$8 sps:$4 sm:$0xff]   ;;  %v2699_v50 = vld [vmem:[#allocation7 + $0x2b4] ss:$8 sps:$4 sm:$0xff]   ;;  %p3038_p2 = pnand %p3037_p1, %p3031_p12 }
  0x7e   :  { %472 = vmatprep.subr.bf16.mxu1 %v2592_v34  ;;  %715 = vmatprep.subr.bf16.mxu0 %v2621_v52  ;;  %v2675_v34 = vld [vmem:[#allocation7 + $0x234] ss:$8 sps:$4 sm:$0xff]   ;;  %v2702_v52 = vld [vmem:[#allocation7 + $0x2c4] ss:$8 sps:$4 sm:$0xff]  }
  0x81   :  { %473 = vmatpush1.bf16.msra.mxu1 %v2594_v35  ;;  %716 = vmatpush1.bf16.msra.mxu0 %v2619_v53  ;;  %v2673_v35 = vld [vmem:[#allocation7 + $0x230] ss:$8 sps:$4 sm:$0xff]   ;;  %v2700_v53 = vld [vmem:[#allocation7 + $0x2c0] ss:$8 sps:$4 sm:$0xff]  }
  0x82   :  { %474 = vmatprep.subr.bf16.mxu1 %v2595_v36  ;;  %717 = vmatprep.subr.bf16.mxu0 %v2624_v54  ;;  %v2678_v36 = vld [vmem:[#allocation7 + $0x244] ss:$8 sps:$4 sm:$0xff]   ;;  %v286_v54 = vlaneseq }
  0x85   :  { %475 = vmatpush1.bf16.msra.mxu1 %v2597_v37  ;;  %718 = vmatpush1.bf16.msra.mxu0 %v2622_v55  ;;  %v2676_v37 = vld [vmem:[#allocation7 + $0x240] ss:$8 sps:$4 sm:$0xff]   ;;  %v287_v55 = vshrl.u32 %v286_v54, 7 }
  0x86   :  { %476 = vmatprep.subr.bf16.mxu1 %v2598_v38  ;;  %719 = vmatprep.subr.bf16.mxu0 %v2627_v56  ;;  %v2681_v38 = vld [vmem:[#allocation7 + $0x254] ss:$8 sps:$4 sm:$0xff]  }
  0x87   :  { %v3200_v56 = vsub.s32 0, %v287_v55 }
  0x89   :  { %477 = vmatpush1.bf16.msra.mxu1 %v2600_v39  ;;  %720 = vmatpush1.bf16.msra.mxu0 %v2625_v57  ;;  %v2679_v39 = vld [vmem:[#allocation7 + $0x250] ss:$8 sps:$4 sm:$0xff]   ;;  %v244_v57 = vld [vmem:[#allocation8] sm:$0x3] }
  0x8a   :  { %478 = vmatprep.subr.bf16.mxu1 %v2601_v40  ;;  %721 = vmatprep.subr.bf16.mxu0 %v2630_v58  ;;  %v2684_v40 = vld [vmem:[#allocation7 + $0x264] ss:$8 sps:$4 sm:$0xff]   ;;  %v3202_v58 = vsub.s32 1, %v287_v55 }
  0x8d   :  { %479 = vmatpush1.bf16.msra.mxu1 %v2603_v41  ;;  %722 = vmatpush1.bf16.msra.mxu0 %v2628_v59  ;;  %v2682_v41 = vld [vmem:[#allocation7 + $0x260] ss:$8 sps:$4 sm:$0xff]   ;;  %v289_v59 = vrot.slane %v244_v57, %v3200_v56 }
  0x8e   :  { %480 = vmatprep.subr.bf16.mxu1 %v2604_v42  ;;  %723 = vmatprep.subr.bf16.mxu0 %v2633_v60  ;;  %v2687_v42 = vld [vmem:[#allocation7 + $0x274] ss:$8 sps:$4 sm:$0xff]   ;;  %v293_v60 = vrot.slane %v244_v57, %v3202_v58 }
  0x91   :  { %481 = vmatpush1.bf16.msra.mxu1 %v2606_v43  ;;  %724 = vmatpush1.bf16.msra.mxu0 %v2631_v61  ;;  %v2685_v43 = vld [vmem:[#allocation7 + $0x270] ss:$8 sps:$4 sm:$0xff]  }
  0x92   :  { %482 = vmatprep.subr.bf16.mxu1 %v2607_v44  ;;  %725 = vmatprep.subr.bf16.mxu0 %v2636_v62  ;;  %v2690_v44 = vld [vmem:[#allocation7 + $0x284] ss:$8 sps:$4 sm:$0xff]  }
  0x95   :  { %483 = vmatpush1.bf16.msra.mxu1 %v2609_v45  ;;  %726 = vmatpush1.bf16.msra.mxu0 %v2634_v63  ;;  %v2688_v45 = vld [vmem:[#allocation7 + $0x280] ss:$8 sps:$4 sm:$0xff]  }
  0x96   :  { %484 = vmatprep.subr.bf16.mxu1 %v2610_v46  ;;  %727 = vmatprep.subr.bf16.mxu0 %v2639_v0  ;;  %v2693_v46 = vld [vmem:[#allocation7 + $0x294] ss:$8 sps:$4 sm:$0xff]  }
  0x99   :  { %485 = vmatpush1.bf16.msra.mxu1 %v2612_v47  ;;  %728 = vmatpush1.bf16.msra.mxu0 %v2637_v1  ;;  %v2691_v47 = vld [vmem:[#allocation7 + $0x290] ss:$8 sps:$4 sm:$0xff]  }
  0x9a   :  { %486 = vmatprep.subr.bf16.mxu1 %v2613_v48  ;;  %729 = vmatprep.subr.bf16.mxu0 %v2642_v2  ;;  %v2696_v48 = vld [vmem:[#allocation7 + $0x2a4] ss:$8 sps:$4 sm:$0xff]  }
  0x9d   :  { %487 = vmatpush1.bf16.msra.mxu1 %v2615_v49  ;;  %730 = vmatpush1.bf16.msra.mxu0 %v2640_v3  ;;  %v2694_v49 = vld [vmem:[#allocation7 + $0x2a0] ss:$8 sps:$4 sm:$0xff]  }
  0x9e   :  { %731 = vmatprep.subr.bf16.mxu0 %v2645_v4  ;;  %970 = vmatprep.subr.bf16.mxu1 %v2666_v29  ;;  %v2726_v29 = vld [vmem:[#allocation7 + $0x344] ss:$8 sps:$4 sm:$0xff]  }
  0xa1   :  { %732 = vmatpush1.bf16.msra.mxu0 %v2643_v5 }
  0xa2   :  { %733 = vmatprep.subr.bf16.mxu0 %v2648_v6 }
  0xa5   :  { %734 = vmatpush1.bf16.msra.mxu0 %v2646_v7 }
  0xa6   :  { %735 = vmatprep.subr.bf16.mxu0 %v2651_v8 }
  0xa9   :  { %736 = vmatpush1.bf16.msra.mxu0 %v2649_v9 }
  0xaa   :  { %737 = vmatprep.subr.bf16.mxu0 %v2654_v10 }
  0xad   :  { %738 = vmatpush1.bf16.msra.mxu0 %v2652_v11 }
  0xae   :  { %739 = vmatprep.subr.bf16.mxu0 %v2657_v22  ;;  %v2714_v22 = vld [vmem:[#allocation7 + $0x304] ss:$8 sps:$4 sm:$0xff]  }
  0xb1   :  { %740 = vmatpush1.bf16.msra.mxu0 %v2655_v23  ;;  %v2717_v23 = vld [vmem:[#allocation7 + $0x314] ss:$8 sps:$4 sm:$0xff]  }
  0xb2   :  { %741 = vmatprep.subr.bf16.mxu0 %v2660_v24  ;;  %v2715_v24 = vld [vmem:[#allocation7 + $0x310] ss:$8 sps:$4 sm:$0xff]  }
  0xb5   :  { %742 = vmatpush1.bf16.msra.mxu0 %v2658_v25  ;;  %v2720_v25 = vld [vmem:[#allocation7 + $0x324] ss:$8 sps:$4 sm:$0xff]  }
  0xb6   :  { %743 = vmatprep.subr.bf16.mxu0 %v2663_v26  ;;  %v2718_v26 = vld [vmem:[#allocation7 + $0x320] ss:$8 sps:$4 sm:$0xff]  }
  0xb9   :  { %744 = vmatpush1.bf16.msra.mxu0 %v2661_v27  ;;  %v2723_v27 = vld [vmem:[#allocation7 + $0x334] ss:$8 sps:$4 sm:$0xff]  }
  0xba   :  { %1227 = vmatprep.subr.bf16.mxu0 %v2714_v22  ;;  %v2777_v22 = vld [vmem:[#allocation7 + $0x454] ss:$8 sps:$4 sm:$0xff]  }
 0x14f   :  { %v3180_v12 = vpop.f32.mrb[0].mxu0 }
 0x150   :  { %v3182_v13 = vpop.f32.mrb[1].mxu0  ;;  %v240_v19 = vmax.f32 %v3180_v12, 0.0  ;;  %v2709_v12 = vld [vmem:[#allocation7 + $0x2f0] ss:$8 sps:$4 sm:$0xff]  }
 0x151   :  { %v3184_v14 = vpop.f32.mrb[2].mxu0  ;;  %v241_v17 = vmax.f32 %v3182_v13, 0.0  ;;  %v2703_v13 = vld [vmem:[#allocation7 + $0x2d0] ss:$8 sps:$4 sm:$0xff]  }
 0x152   :  { %v242_v15 = vmax.f32 %v3184_v14, 0.0  ;;  %v3187_v16 = vpop.f32.mrb[3].mxu0 }
 0x153   :  { %v243_v18 = vmax.f32 %v3187_v16, 0.0  ;;  %v2706_v16 = vld [vmem:[#allocation7 + $0x2e0] ss:$8 sps:$4 sm:$0xff]  }
 0x154   :  { %v251_v21 = vpack.c.bf16 %v242_v15, %v240_v19 }
 0x155   :  { %v252_v20 = vpack.c.bf16 %v243_v18, %v241_v17 }
 0x157   :  { %488 = vmatprep.mubr.bf16.mxu1 %v252_v20 }
 0x158   :  { %489 = vmatmul.mubr.bf16.vlgmr.msra.gmra.mrb[0].mxu1 %v251_v21 }
 0x159   :  { %971 = vmatpush1.bf16.msra.mxu1 %v2664_v28  ;;  %v2721_v28 = vld [vmem:[#allocation7 + $0x330] ss:$8 sps:$4 sm:$0xff]  }
 0x15a   :  { %972 = vmatprep.subr.bf16.mxu1 %v2669_v30  ;;  %v2724_v30 = vld [vmem:[#allocation7 + $0x340] ss:$8 sps:$4 sm:$0xff]  }
 0x15d   :  { %973 = vmatpush1.bf16.msra.mxu1 %v2667_v31  ;;  %v2729_v31 = vld [vmem:[#allocation7 + $0x354] ss:$8 sps:$4 sm:$0xff]  }
 0x15e   :  { %974 = vmatprep.subr.bf16.mxu1 %v2672_v32  ;;  %v2727_v32 = vld [vmem:[#allocation7 + $0x350] ss:$8 sps:$4 sm:$0xff]  }
 0x161   :  { %975 = vmatpush1.bf16.msra.mxu1 %v2670_v33  ;;  %v2732_v33 = vld [vmem:[#allocation7 + $0x364] ss:$8 sps:$4 sm:$0xff]  }
 0x162   :  { %976 = vmatprep.subr.bf16.mxu1 %v2675_v34  ;;  %v2730_v34 = vld [vmem:[#allocation7 + $0x360] ss:$8 sps:$4 sm:$0xff]  }
 0x165   :  { %977 = vmatpush1.bf16.msra.mxu1 %v2673_v35  ;;  %v2735_v35 = vld [vmem:[#allocation7 + $0x374] ss:$8 sps:$4 sm:$0xff]  }
 0x166   :  { %978 = vmatprep.subr.bf16.mxu1 %v2678_v36  ;;  %v2733_v36 = vld [vmem:[#allocation7 + $0x370] ss:$8 sps:$4 sm:$0xff]  }
 0x169   :  { %979 = vmatpush1.bf16.msra.mxu1 %v2676_v37  ;;  %v2738_v37 = vld [vmem:[#allocation7 + $0x384] ss:$8 sps:$4 sm:$0xff]  }
 0x16a   :  { %980 = vmatprep.subr.bf16.mxu1 %v2681_v38  ;;  %v2736_v38 = vld [vmem:[#allocation7 + $0x380] ss:$8 sps:$4 sm:$0xff]  }
 0x16d   :  { %981 = vmatpush1.bf16.msra.mxu1 %v2679_v39  ;;  %v2741_v39 = vld [vmem:[#allocation7 + $0x394] ss:$8 sps:$4 sm:$0xff]  }
 0x16e   :  { %982 = vmatprep.subr.bf16.mxu1 %v2684_v40  ;;  %v2739_v40 = vld [vmem:[#allocation7 + $0x390] ss:$8 sps:$4 sm:$0xff]  }
 0x171   :  { %983 = vmatpush1.bf16.msra.mxu1 %v2682_v41  ;;  %v2744_v41 = vld [vmem:[#allocation7 + $0x3a4] ss:$8 sps:$4 sm:$0xff]  }
 0x172   :  { %984 = vmatprep.subr.bf16.mxu1 %v2687_v42  ;;  %v2742_v42 = vld [vmem:[#allocation7 + $0x3a0] ss:$8 sps:$4 sm:$0xff]  }
 0x175   :  { %985 = vmatpush1.bf16.msra.mxu1 %v2685_v43  ;;  %v2747_v43 = vld [vmem:[#allocation7 + $0x3b4] ss:$8 sps:$4 sm:$0xff]  }
 0x176   :  { %986 = vmatprep.subr.bf16.mxu1 %v2690_v44  ;;  %v2745_v44 = vld [vmem:[#allocation7 + $0x3b0] ss:$8 sps:$4 sm:$0xff]  }
 0x179   :  { %987 = vmatpush1.bf16.msra.mxu1 %v2688_v45  ;;  %v2750_v45 = vld [vmem:[#allocation7 + $0x3c4] ss:$8 sps:$4 sm:$0xff]  }
 0x17a   :  { %988 = vmatprep.subr.bf16.mxu1 %v2693_v46  ;;  %v2748_v46 = vld [vmem:[#allocation7 + $0x3c0] ss:$8 sps:$4 sm:$0xff]  }
 0x17d   :  { %989 = vmatpush1.bf16.msra.mxu1 %v2691_v47  ;;  %v245_v47 = vld [vmem:[#allocation8 + $0x2] sm:$0x3] }
 0x17e   :  { %990 = vmatprep.subr.bf16.mxu1 %v2696_v48  ;;  %v546_v48 = vrot.slane %v245_v47, %v3200_v56 }
 0x181   :  { %991 = vmatpush1.bf16.msra.mxu1 %v2694_v49  ;;  %v550_v49 = vrot.slane %v245_v47, %v3202_v58 }
 0x182   :  { %992 = vmatprep.subr.bf16.mxu1 %v2699_v50 }
 0x185   :  { %993 = vmatpush1.bf16.msra.mxu1 %v2697_v51 }
 0x186   :  { %994 = vmatprep.subr.bf16.mxu1 %v2702_v52 }
 0x189   :  { %995 = vmatpush1.bf16.msra.mxu1 %v2700_v53 }
 0x22b   :  { %v490_v61 = vpop.f32.mrb[0].mxu1 }
 0x22c   :  { %v491_v62 = vadd.f32 %v490_v61, %v289_v59  ;;  %v492_v63 = vpop.f32.mrb[1].mxu1 }
 0x22d   :  { %v493_v0 = vadd.f32 %v492_v63, %v293_v60  ;;  %v494_v1 = vpop.f32.mrb[2].mxu1 }
 0x22e   :  { %v495_v2 = vadd.f32 %v494_v1, %v289_v59  ;;  %v496_v3 = vpop.f32.mrb[3].mxu1  ;;  %v499_v6 = vmax.f32 %v491_v62, 0.0 }
 0x22f   :  { %v500_v4 = vmax.f32 %v493_v0, 0.0  ;;  %v497_v5 = vadd.f32 %v496_v3, %v293_v60 }
 0x230   :  { %v501_v7 = vmax.f32 %v495_v2, 0.0  ;;  %v3220_v20 = vadd.f32 %v499_v6, %v240_v19  ;;  %v2712_v19 = vld [vmem:[#allocation7 + $0x300] ss:$8 sps:$4 sm:$0xff]   ;;  %v2753_v6 = vld [vmem:[#allocation7 + $0x3d4] ss:$8 sps:$4 sm:$0xff]  }
 0x231   :  { %v502_v8 = vmax.f32 %v497_v5, 0.0  ;;  %v3212_v10 = vadd.f32 %v500_v4, %v241_v17  ;;  %v2708_v17 = vld [vmem:[#allocation7 + $0x2e4] ss:$8 sps:$4 sm:$0xff]  }
 0x232   :  { %v3208_v9 = vadd.f32 %v501_v7, %v242_v15  ;;  %v2705_v15 = vld [vmem:[#allocation7 + $0x2d4] ss:$8 sps:$4 sm:$0xff]   ;;  %v2751_v7 = vld [vmem:[#allocation7 + $0x3d0] ss:$8 sps:$4 sm:$0xff]  }
 0x233   :  { %v3216_v11 = vadd.f32 %v502_v8, %v243_v18  ;;  %996 = vmatprep.subr.bf16.mxu1 %v2705_v15  ;;  %v2711_v18 = vld [vmem:[#allocation7 + $0x2f4] ss:$8 sps:$4 sm:$0xff]   ;;  %v2756_v8 = vld [vmem:[#allocation7 + $0x3e4] ss:$8 sps:$4 sm:$0xff]   ;;  %v2763_v15 = vld [vmem:[#allocation7 + $0x410] ss:$8 sps:$4 sm:$0xff]  }
 0x234   :  { %v507_v14 = vpack.c.bf16 %v3208_v9, %v3220_v20  ;;  %997 = vmatpush1.bf16.msra.mxu1 %v2703_v13  ;;  %v2768_v13 = vld [vmem:[#allocation7 + $0x424] ss:$8 sps:$4 sm:$0xff]  }
 0x235   :  { %v508_v21 = vpack.c.bf16 %v3216_v11, %v3212_v10  ;;  %998 = vmatprep.subr.bf16.mxu1 %v2708_v17  ;;  %v2766_v17 = vld [vmem:[#allocation7 + $0x420] ss:$8 sps:$4 sm:$0xff]  }
 0x237   :  { %745 = vmatprep.mubr.bf16.mxu0 %v508_v21  ;;  %v2762_v21 = vld [vmem:[#allocation7 + $0x404] ss:$8 sps:$4 sm:$0xff]  }
 0x238   :  { %746 = vmatmul.mubr.bf16.vlgmr.msra.gmra.mrb[4].mxu0 %v507_v14  ;;  %999 = vmatpush1.bf16.msra.mxu1 %v2706_v16  ;;  %v2765_v14 = vld [vmem:[#allocation7 + $0x414] ss:$8 sps:$4 sm:$0xff]  }
 0x239   :  { %1000 = vmatprep.subr.bf16.mxu1 %v2711_v18  ;;  %1228 = vmatpush1.bf16.msra.mxu0 %v2712_v19  ;;  %v2771_v16 = vld [vmem:[#allocation7 + $0x434] ss:$8 sps:$4 sm:$0xff]   ;;  %v2769_v18 = vld [vmem:[#allocation7 + $0x430] ss:$8 sps:$4 sm:$0xff]   ;;  %v2772_v19 = vld [vmem:[#allocation7 + $0x440] ss:$8 sps:$4 sm:$0xff]  }
 0x23a   :  { %1229 = vmatprep.subr.bf16.mxu0 %v2717_v23  ;;  %v2775_v23 = vld [vmem:[#allocation7 + $0x450] ss:$8 sps:$4 sm:$0xff]  }
 0x23c   :  { %1001 = vmatpush1.bf16.msra.mxu1 %v2709_v12  ;;  %v2774_v12 = vld [vmem:[#allocation7 + $0x444] ss:$8 sps:$4 sm:$0xff]  }
 0x23d   :  { %1230 = vmatpush1.bf16.msra.mxu0 %v2715_v24  ;;  %1484 = vmatprep.subr.bf16.mxu1 %v2762_v21  ;;  %v2780_v24 = vld [vmem:[#allocation7 + $0x464] ss:$8 sps:$4 sm:$0xff]   ;;  %v2825_v21 = vld [vmem:[#allocation7 + $0x554] ss:$8 sps:$4 sm:$0xff]  }
 0x23e   :  { %1231 = vmatprep.subr.bf16.mxu0 %v2720_v25  ;;  %v2778_v25 = vld [vmem:[#allocation7 + $0x460] ss:$8 sps:$4 sm:$0xff]  }
 0x241   :  { %1232 = vmatpush1.bf16.msra.mxu0 %v2718_v26  ;;  %v2783_v26 = vld [vmem:[#allocation7 + $0x474] ss:$8 sps:$4 sm:$0xff]  }
 0x242   :  { %1233 = vmatprep.subr.bf16.mxu0 %v2723_v27  ;;  %v2781_v27 = vld [vmem:[#allocation7 + $0x470] ss:$8 sps:$4 sm:$0xff]  }
 0x245   :  { %1234 = vmatpush1.bf16.msra.mxu0 %v2721_v28  ;;  %v2786_v28 = vld [vmem:[#allocation7 + $0x484] ss:$8 sps:$4 sm:$0xff]  }
 0x246   :  { %1235 = vmatprep.subr.bf16.mxu0 %v2726_v29  ;;  %v2784_v29 = vld [vmem:[#allocation7 + $0x480] ss:$8 sps:$4 sm:$0xff]  }
 0x249   :  { %1236 = vmatpush1.bf16.msra.mxu0 %v2724_v30  ;;  %v2789_v30 = vld [vmem:[#allocation7 + $0x494] ss:$8 sps:$4 sm:$0xff]  }
 0x24a   :  { %1237 = vmatprep.subr.bf16.mxu0 %v2729_v31  ;;  %v2787_v31 = vld [vmem:[#allocation7 + $0x490] ss:$8 sps:$4 sm:$0xff]  }
 0x24d   :  { %1238 = vmatpush1.bf16.msra.mxu0 %v2727_v32  ;;  %v2792_v32 = vld [vmem:[#allocation7 + $0x4a4] ss:$8 sps:$4 sm:$0xff]  }
 0x24e   :  { %1239 = vmatprep.subr.bf16.mxu0 %v2732_v33  ;;  %v2790_v33 = vld [vmem:[#allocation7 + $0x4a0] ss:$8 sps:$4 sm:$0xff]  }
 0x251   :  { %1240 = vmatpush1.bf16.msra.mxu0 %v2730_v34  ;;  %v2795_v34 = vld [vmem:[#allocation7 + $0x4b4] ss:$8 sps:$4 sm:$0xff]  }
 0x252   :  { %1241 = vmatprep.subr.bf16.mxu0 %v2735_v35  ;;  %v2793_v35 = vld [vmem:[#allocation7 + $0x4b0] ss:$8 sps:$4 sm:$0xff]  }
 0x255   :  { %1242 = vmatpush1.bf16.msra.mxu0 %v2733_v36  ;;  %v2798_v36 = vld [vmem:[#allocation7 + $0x4c4] ss:$8 sps:$4 sm:$0xff]  }
 0x256   :  { %1243 = vmatprep.subr.bf16.mxu0 %v2738_v37  ;;  %v2796_v37 = vld [vmem:[#allocation7 + $0x4c0] ss:$8 sps:$4 sm:$0xff]  }
 0x259   :  { %1244 = vmatpush1.bf16.msra.mxu0 %v2736_v38  ;;  %v246_v38 = vld [vmem:[#allocation8 + $0x4] sm:$0x3] }
 0x25a   :  { %1245 = vmatprep.subr.bf16.mxu0 %v2741_v39  ;;  %v803_v39 = vrot.slane %v246_v38, %v3200_v56 }
 0x25d   :  { %1246 = vmatpush1.bf16.msra.mxu0 %v2739_v40  ;;  %v807_v40 = vrot.slane %v246_v38, %v3202_v58 }
 0x25e   :  { %1247 = vmatprep.subr.bf16.mxu0 %v2744_v41 }
 0x261   :  { %1248 = vmatpush1.bf16.msra.mxu0 %v2742_v42 }
 0x262   :  { %1249 = vmatprep.subr.bf16.mxu0 %v2747_v43 }
 0x265   :  { %1250 = vmatpush1.bf16.msra.mxu0 %v2745_v44 }
 0x266   :  { %1251 = vmatprep.subr.bf16.mxu0 %v2750_v45 }
 0x269   :  { %1252 = vmatpush1.bf16.msra.mxu0 %v2748_v46 }
 0x26a   :  { %1253 = vmatprep.subr.bf16.mxu0 %v2753_v6  ;;  %v2811_v6 = vld [vmem:[#allocation7 + $0x510] ss:$8 sps:$4 sm:$0xff]  }
 0x26d   :  { %1254 = vmatpush1.bf16.msra.mxu0 %v2751_v7  ;;  %v2816_v7 = vld [vmem:[#allocation7 + $0x524] ss:$8 sps:$4 sm:$0xff]  }
 0x26e   :  { %1255 = vmatprep.subr.bf16.mxu0 %v2756_v8  ;;  %v2814_v8 = vld [vmem:[#allocation7 + $0x520] ss:$8 sps:$4 sm:$0xff]  }
 0x30b   :  { %v747_v50 = vpop.f32.mrb[4].mxu0 }
 0x30c   :  { %v748_v51 = vadd.f32 %v747_v50, %v546_v48  ;;  %v749_v52 = vpop.f32.mrb[5].mxu0 }
 0x30d   :  { %v750_v53 = vadd.f32 %v749_v52, %v550_v49  ;;  %v751_v54 = vpop.f32.mrb[6].mxu0 }
 0x30e   :  { %v752_v55 = vadd.f32 %v751_v54, %v546_v48  ;;  %v753_v57 = vpop.f32.mrb[7].mxu0  ;;  %v756_v61 = vmax.f32 %v748_v51, 0.0 }
 0x30f   :  { %v757_v59 = vmax.f32 %v750_v53, 0.0  ;;  %v754_v60 = vadd.f32 %v753_v57, %v550_v49 }
 0x310   :  { %v758_v62 = vmax.f32 %v752_v55, 0.0  ;;  %v3238_v3 = vadd.f32 %v756_v61, %v3220_v20  ;;  %v2760_v20 = vld [vmem:[#allocation7 + $0x400] ss:$8 sps:$4 sm:$0xff]   ;;  %v2801_v61 = vld [vmem:[#allocation7 + $0x4d4] ss:$8 sps:$4 sm:$0xff]  }
 0x311   :  { %v759_v63 = vmax.f32 %v754_v60, 0.0  ;;  %v3232_v1 = vadd.f32 %v757_v59, %v3212_v10  ;;  %v2759_v10 = vld [vmem:[#allocation7 + $0x3f4] ss:$8 sps:$4 sm:$0xff]  }
 0x312   :  { %v3229_v0 = vadd.f32 %v758_v62, %v3208_v9  ;;  %v2754_v9 = vld [vmem:[#allocation7 + $0x3e0] ss:$8 sps:$4 sm:$0xff]   ;;  %v2799_v62 = vld [vmem:[#allocation7 + $0x4d0] ss:$8 sps:$4 sm:$0xff]  }
 0x313   :  { %v3235_v2 = vadd.f32 %v759_v63, %v3216_v11  ;;  %1256 = vmatpush1.bf16.msra.mxu0 %v2754_v9  ;;  %v2757_v11 = vld [vmem:[#allocation7 + $0x3f0] ss:$8 sps:$4 sm:$0xff]   ;;  %v2804_v63 = vld [vmem:[#allocation7 + $0x4e4] ss:$8 sps:$4 sm:$0xff]   ;;  %v2819_v9 = vld [vmem:[#allocation7 + $0x534] ss:$8 sps:$4 sm:$0xff]  }
 0x314   :  { %v764_v5 = vpack.c.bf16 %v3229_v0, %v3238_v3  ;;  %1257 = vmatprep.subr.bf16.mxu0 %v2759_v10  ;;  %v2817_v10 = vld [vmem:[#allocation7 + $0x530] ss:$8 sps:$4 sm:$0xff]  }
 0x315   :  { %v765_v4 = vpack.c.bf16 %v3235_v2, %v3232_v1 }
 0x317   :  { %1002 = vmatprep.mubr.bf16.mxu1 %v765_v4  ;;  %1258 = vmatpush1.bf16.msra.mxu0 %v2757_v11  ;;  %v2810_v4 = vld [vmem:[#allocation7 + $0x504] ss:$8 sps:$4 sm:$0xff]  }
 0x318   :  { %1003 = vmatmul.mubr.bf16.vlgmr.msra.gmra.mrb[4].mxu1 %v764_v5  ;;  %v2813_v5 = vld [vmem:[#allocation7 + $0x514] ss:$8 sps:$4 sm:$0xff]   ;;  %1741 = vmatprep.subr.bf16.mxu0 %v2810_v4  ;;  %v2822_v11 = vld [vmem:[#allocation7 + $0x544] ss:$8 sps:$4 sm:$0xff]  }
 0x319   :  { %1485 = vmatpush1.bf16.msra.mxu1 %v2760_v20  ;;  %v2820_v20 = vld [vmem:[#allocation7 + $0x540] ss:$8 sps:$4 sm:$0xff]   ;;  %v2873_v4 = vld [vmem:[#allocation7 + $0x654] ss:$8 sps:$4 sm:$0xff]  }
 0x31a   :  { %1486 = vmatprep.subr.bf16.mxu1 %v2765_v14  ;;  %v2823_v14 = vld [vmem:[#allocation7 + $0x550] ss:$8 sps:$4 sm:$0xff]  }
 0x31d   :  { %1487 = vmatpush1.bf16.msra.mxu1 %v2763_v15  ;;  %v2828_v15 = vld [vmem:[#allocation7 + $0x564] ss:$8 sps:$4 sm:$0xff]  }
 0x31e   :  { %1488 = vmatprep.subr.bf16.mxu1 %v2768_v13  ;;  %v2826_v13 = vld [vmem:[#allocation7 + $0x560] ss:$8 sps:$4 sm:$0xff]  }
 0x321   :  { %1489 = vmatpush1.bf16.msra.mxu1 %v2766_v17  ;;  %v2831_v17 = vld [vmem:[#allocation7 + $0x574] ss:$8 sps:$4 sm:$0xff]  }
 0x322   :  { %1490 = vmatprep.subr.bf16.mxu1 %v2771_v16  ;;  %v2829_v16 = vld [vmem:[#allocation7 + $0x570] ss:$8 sps:$4 sm:$0xff]  }
 0x325   :  { %1491 = vmatpush1.bf16.msra.mxu1 %v2769_v18  ;;  %v2834_v18 = vld [vmem:[#allocation7 + $0x584] ss:$8 sps:$4 sm:$0xff]  }
 0x326   :  { %1492 = vmatprep.subr.bf16.mxu1 %v2774_v12  ;;  %v2832_v12 = vld [vmem:[#allocation7 + $0x580] ss:$8 sps:$4 sm:$0xff]  }
 0x329   :  { %1493 = vmatpush1.bf16.msra.mxu1 %v2772_v19  ;;  %v2837_v19 = vld [vmem:[#allocation7 + $0x594] ss:$8 sps:$4 sm:$0xff]  }
 0x32a   :  { %1494 = vmatprep.subr.bf16.mxu1 %v2777_v22  ;;  %v2835_v22 = vld [vmem:[#allocation7 + $0x590] ss:$8 sps:$4 sm:$0xff]  }
 0x32d   :  { %1495 = vmatpush1.bf16.msra.mxu1 %v2775_v23  ;;  %v2840_v23 = vld [vmem:[#allocation7 + $0x5a4] ss:$8 sps:$4 sm:$0xff]  }
 0x32e   :  { %1496 = vmatprep.subr.bf16.mxu1 %v2780_v24  ;;  %v2838_v24 = vld [vmem:[#allocation7 + $0x5a0] ss:$8 sps:$4 sm:$0xff]  }
 0x331   :  { %1497 = vmatpush1.bf16.msra.mxu1 %v2778_v25  ;;  %v2843_v25 = vld [vmem:[#allocation7 + $0x5b4] ss:$8 sps:$4 sm:$0xff]  }
 0x332   :  { %1498 = vmatprep.subr.bf16.mxu1 %v2783_v26  ;;  %v2841_v26 = vld [vmem:[#allocation7 + $0x5b0] ss:$8 sps:$4 sm:$0xff]  }
 0x335   :  { %1499 = vmatpush1.bf16.msra.mxu1 %v2781_v27  ;;  %v2846_v27 = vld [vmem:[#allocation7 + $0x5c4] ss:$8 sps:$4 sm:$0xff]  }
 0x336   :  { %1500 = vmatprep.subr.bf16.mxu1 %v2786_v28  ;;  %v2844_v28 = vld [vmem:[#allocation7 + $0x5c0] ss:$8 sps:$4 sm:$0xff]  }
 0x339   :  { %1501 = vmatpush1.bf16.msra.mxu1 %v2784_v29  ;;  %v247_v29 = vld [vmem:[#allocation8 + $0x6] sm:$0x3] }
 0x33a   :  { %1502 = vmatprep.subr.bf16.mxu1 %v2789_v30  ;;  %v1060_v30 = vrot.slane %v247_v29, %v3200_v56 }
 0x33d   :  { %1503 = vmatpush1.bf16.msra.mxu1 %v2787_v31  ;;  %v1064_v31 = vrot.slane %v247_v29, %v3202_v58 }
 0x33e   :  { %1504 = vmatprep.subr.bf16.mxu1 %v2792_v32 }
 0x341   :  { %1505 = vmatpush1.bf16.msra.mxu1 %v2790_v33 }
 0x342   :  { %1506 = vmatprep.subr.bf16.mxu1 %v2795_v34 }
 0x345   :  { %1507 = vmatpush1.bf16.msra.mxu1 %v2793_v35 }
 0x346   :  { %1508 = vmatprep.subr.bf16.mxu1 %v2798_v36 }
 0x349   :  { %1509 = vmatpush1.bf16.msra.mxu1 %v2796_v37 }
 0x34a   :  { %1510 = vmatprep.subr.bf16.mxu1 %v2801_v61  ;;  %v2859_v61 = vld [vmem:[#allocation7 + $0x610] ss:$8 sps:$4 sm:$0xff]  }
 0x34d   :  { %1511 = vmatpush1.bf16.msra.mxu1 %v2799_v62  ;;  %v2864_v62 = vld [vmem:[#allocation7 + $0x624] ss:$8 sps:$4 sm:$0xff]  }
 0x34e   :  { %1512 = vmatprep.subr.bf16.mxu1 %v2804_v63  ;;  %v2862_v63 = vld [vmem:[#allocation7 + $0x620] ss:$8 sps:$4 sm:$0xff]  }
 0x3eb   :  { %v1004_v41 = vpop.f32.mrb[4].mxu1 }
 0x3ec   :  { %v1005_v42 = vadd.f32 %v1004_v41, %v803_v39  ;;  %v1006_v43 = vpop.f32.mrb[5].mxu1 }
 0x3ed   :  { %v1007_v44 = vadd.f32 %v1006_v43, %v807_v40  ;;  %v1008_v45 = vpop.f32.mrb[6].mxu1 }
 0x3ee   :  { %v1009_v46 = vadd.f32 %v1008_v45, %v803_v39  ;;  %v1010_v47 = vpop.f32.mrb[7].mxu1  ;;  %v1013_v50 = vmax.f32 %v1005_v42, 0.0 }
 0x3ef   :  { %v1014_v48 = vmax.f32 %v1007_v44, 0.0  ;;  %v1011_v49 = vadd.f32 %v1010_v47, %v807_v40 }
 0x3f0   :  { %v1015_v51 = vmax.f32 %v1009_v46, 0.0  ;;  %v3256_v57 = vadd.f32 %v1013_v50, %v3238_v3  ;;  %v2808_v3 = vld [vmem:[#allocation7 + $0x500] ss:$8 sps:$4 sm:$0xff]   ;;  %v2849_v50 = vld [vmem:[#allocation7 + $0x5d4] ss:$8 sps:$4 sm:$0xff]  }
 0x3f1   :  { %v1016_v52 = vmax.f32 %v1011_v49, 0.0  ;;  %v3250_v54 = vadd.f32 %v1014_v48, %v3232_v1  ;;  %v2807_v1 = vld [vmem:[#allocation7 + $0x4f4] ss:$8 sps:$4 sm:$0xff]  }
 0x3f2   :  { %v3247_v53 = vadd.f32 %v1015_v51, %v3229_v0  ;;  %v2802_v0 = vld [vmem:[#allocation7 + $0x4e0] ss:$8 sps:$4 sm:$0xff]   ;;  %v2847_v51 = vld [vmem:[#allocation7 + $0x5d0] ss:$8 sps:$4 sm:$0xff]  }
 0x3f3   :  { %v3253_v55 = vadd.f32 %v1016_v52, %v3235_v2  ;;  %1513 = vmatpush1.bf16.msra.mxu1 %v2802_v0  ;;  %v2805_v2 = vld [vmem:[#allocation7 + $0x4f0] ss:$8 sps:$4 sm:$0xff]   ;;  %v2852_v52 = vld [vmem:[#allocation7 + $0x5e4] ss:$8 sps:$4 sm:$0xff]   ;;  %v2867_v0 = vld [vmem:[#allocation7 + $0x634] ss:$8 sps:$4 sm:$0xff]  }
 0x3f4   :  { %v1021_v60 = vpack.c.bf16 %v3247_v53, %v3256_v57  ;;  %1514 = vmatprep.subr.bf16.mxu1 %v2807_v1  ;;  %v2865_v1 = vld [vmem:[#allocation7 + $0x630] ss:$8 sps:$4 sm:$0xff]  }
 0x3f5   :  { %v1022_v59 = vpack.c.bf16 %v3253_v55, %v3250_v54 }
 0x3f7   :  { %1259 = vmatprep.mubr.bf16.mxu0 %v1022_v59  ;;  %1515 = vmatpush1.bf16.msra.mxu1 %v2805_v2  ;;  %v2858_v59 = vld [vmem:[#allocation7 + $0x604] ss:$8 sps:$4 sm:$0xff]  }
 0x3f8   :  { %1260 = vmatmul.mubr.bf16.vlgmr.msra.gmra.mrb[8].mxu0 %v1021_v60  ;;  %v2861_v60 = vld [vmem:[#allocation7 + $0x614] ss:$8 sps:$4 sm:$0xff]   ;;  %1998 = vmatprep.subr.bf16.mxu1 %v2858_v59  ;;  %v2870_v2 = vld [vmem:[#allocation7 + $0x644] ss:$8 sps:$4 sm:$0xff]   ;;  %v249_v59 = vld [vmem:[#allocation8 + $0xa] sm:$0x3] }
 0x3f9   :  { %1742 = vmatpush1.bf16.msra.mxu0 %v2808_v3  ;;  %v2868_v3 = vld [vmem:[#allocation7 + $0x640] ss:$8 sps:$4 sm:$0xff]  }
 0x3fa   :  { %1743 = vmatprep.subr.bf16.mxu0 %v2813_v5  ;;  %v2871_v5 = vld [vmem:[#allocation7 + $0x650] ss:$8 sps:$4 sm:$0xff]  }
 0x3fd   :  { %1744 = vmatpush1.bf16.msra.mxu0 %v2811_v6  ;;  %v2876_v6 = vld [vmem:[#allocation7 + $0x664] ss:$8 sps:$4 sm:$0xff]  }
 0x3fe   :  { %1745 = vmatprep.subr.bf16.mxu0 %v2816_v7  ;;  %v2874_v7 = vld [vmem:[#allocation7 + $0x660] ss:$8 sps:$4 sm:$0xff]  }
 0x401   :  { %1746 = vmatpush1.bf16.msra.mxu0 %v2814_v8  ;;  %v2879_v8 = vld [vmem:[#allocation7 + $0x674] ss:$8 sps:$4 sm:$0xff]  }
 0x402   :  { %1747 = vmatprep.subr.bf16.mxu0 %v2819_v9  ;;  %v2877_v9 = vld [vmem:[#allocation7 + $0x670] ss:$8 sps:$4 sm:$0xff]  }
 0x405   :  { %1748 = vmatpush1.bf16.msra.mxu0 %v2817_v10  ;;  %v2882_v10 = vld [vmem:[#allocation7 + $0x684] ss:$8 sps:$4 sm:$0xff]  }
 0x406   :  { %1749 = vmatprep.subr.bf16.mxu0 %v2822_v11  ;;  %v2880_v11 = vld [vmem:[#allocation7 + $0x680] ss:$8 sps:$4 sm:$0xff]  }
 0x409   :  { %1750 = vmatpush1.bf16.msra.mxu0 %v2820_v20  ;;  %v2885_v20 = vld [vmem:[#allocation7 + $0x694] ss:$8 sps:$4 sm:$0xff]  }
 0x40a   :  { %1751 = vmatprep.subr.bf16.mxu0 %v2825_v21  ;;  %v2883_v21 = vld [vmem:[#allocation7 + $0x690] ss:$8 sps:$4 sm:$0xff]  }
 0x40d   :  { %1752 = vmatpush1.bf16.msra.mxu0 %v2823_v14  ;;  %v2888_v14 = vld [vmem:[#allocation7 + $0x6a4] ss:$8 sps:$4 sm:$0xff]  }
 0x40e   :  { %1753 = vmatprep.subr.bf16.mxu0 %v2828_v15  ;;  %v2886_v15 = vld [vmem:[#allocation7 + $0x6a0] ss:$8 sps:$4 sm:$0xff]  }
 0x411   :  { %1754 = vmatpush1.bf16.msra.mxu0 %v2826_v13  ;;  %v2891_v13 = vld [vmem:[#allocation7 + $0x6b4] ss:$8 sps:$4 sm:$0xff]  }
 0x412   :  { %1755 = vmatprep.subr.bf16.mxu0 %v2831_v17  ;;  %v2889_v17 = vld [vmem:[#allocation7 + $0x6b0] ss:$8 sps:$4 sm:$0xff]  }
 0x415   :  { %1756 = vmatpush1.bf16.msra.mxu0 %v2829_v16  ;;  %v2894_v16 = vld [vmem:[#allocation7 + $0x6c4] ss:$8 sps:$4 sm:$0xff]  }
 0x416   :  { %1757 = vmatprep.subr.bf16.mxu0 %v2834_v18  ;;  %v2892_v18 = vld [vmem:[#allocation7 + $0x6c0] ss:$8 sps:$4 sm:$0xff]  }
 0x419   :  { %1758 = vmatpush1.bf16.msra.mxu0 %v2832_v12  ;;  %v248_v12 = vld [vmem:[#allocation8 + $0x8] sm:$0x3] }
 0x41a   :  { %1759 = vmatprep.subr.bf16.mxu0 %v2837_v19  ;;  %v1317_v19 = vrot.slane %v248_v12, %v3200_v56 }
 0x41d   :  { %1760 = vmatpush1.bf16.msra.mxu0 %v2835_v22  ;;  %v1321_v22 = vrot.slane %v248_v12, %v3202_v58  ;;  %v2918_v12 = vld [vmem:[#allocation10 + $0x78] sm:$0xff]  }
 0x41e   :  { %1761 = vmatprep.subr.bf16.mxu0 %v2840_v23 }
 0x421   :  { %1762 = vmatpush1.bf16.msra.mxu0 %v2838_v24 }
 0x422   :  { %1763 = vmatprep.subr.bf16.mxu0 %v2843_v25 }
 0x425   :  { %1764 = vmatpush1.bf16.msra.mxu0 %v2841_v26 }
 0x426   :  { %1765 = vmatprep.subr.bf16.mxu0 %v2846_v27 }
 0x429   :  { %1766 = vmatpush1.bf16.msra.mxu0 %v2844_v28 }
 0x42a   :  { %1767 = vmatprep.subr.bf16.mxu0 %v2849_v50  ;;  %v2906_v50 = vld [vmem:[#allocation10 + $0x48] sm:$0xff]  }
 0x42d   :  { %1768 = vmatpush1.bf16.msra.mxu0 %v2847_v51  ;;  %v2908_v51 = vld [vmem:[#allocation10 + $0x50] sm:$0xff]  }
 0x42e   :  { %1769 = vmatprep.subr.bf16.mxu0 %v2852_v52  ;;  %v2909_v52 = vld [vmem:[#allocation10 + $0x10] sm:$0xff]  }
 0x4cb   :  { %v1261_v32 = vpop.f32.mrb[8].mxu0 }
 0x4cc   :  { %v1262_v33 = vadd.f32 %v1261_v32, %v1060_v30  ;;  %v1263_v34 = vpop.f32.mrb[9].mxu0 }
 0x4cd   :  { %v1264_v35 = vadd.f32 %v1263_v34, %v1064_v31  ;;  %v1265_v36 = vpop.f32.mrb[10].mxu0 }
 0x4ce   :  { %v1266_v37 = vadd.f32 %v1265_v36, %v1060_v30  ;;  %v1267_v38 = vpop.f32.mrb[11].mxu0  ;;  %v1270_v41 = vmax.f32 %v1262_v33, 0.0 }
 0x4cf   :  { %v1271_v39 = vmax.f32 %v1264_v35, 0.0  ;;  %v1268_v40 = vadd.f32 %v1267_v38, %v1064_v31 }
 0x4d0   :  { %v1272_v42 = vmax.f32 %v1266_v37, 0.0  ;;  %v3274_v47 = vadd.f32 %v1270_v41, %v3256_v57  ;;  %v2856_v57 = vld [vmem:[#allocation7 + $0x600] ss:$8 sps:$4 sm:$0xff]   ;;  %v2897_v41 = vld [vmem:[#allocation7 + $0x6d4] ss:$8 sps:$4 sm:$0xff]  }
 0x4d1   :  { %v1273_v43 = vmax.f32 %v1268_v40, 0.0  ;;  %v3268_v45 = vadd.f32 %v1271_v39, %v3250_v54  ;;  %v2855_v54 = vld [vmem:[#allocation7 + $0x5f4] ss:$8 sps:$4 sm:$0xff]  }
 0x4d2   :  { %v3265_v44 = vadd.f32 %v1272_v42, %v3247_v53  ;;  %v2850_v53 = vld [vmem:[#allocation7 + $0x5e0] ss:$8 sps:$4 sm:$0xff]   ;;  %v2895_v42 = vld [vmem:[#allocation7 + $0x6d0] ss:$8 sps:$4 sm:$0xff]  }
 0x4d3   :  { %v3271_v46 = vadd.f32 %v1273_v43, %v3253_v55  ;;  %1770 = vmatpush1.bf16.msra.mxu0 %v2850_v53  ;;  %v2853_v55 = vld [vmem:[#allocation7 + $0x5f0] ss:$8 sps:$4 sm:$0xff]   ;;  %v2900_v43 = vld [vmem:[#allocation7 + $0x6e4] ss:$8 sps:$4 sm:$0xff]  }
 0x4d4   :  { %v1278_v49 = vpack.c.bf16 %v3265_v44, %v3274_v47  ;;  %1771 = vmatprep.subr.bf16.mxu0 %v2855_v54  ;;  %v2910_v53 = vld [vmem:[#allocation10 + $0x58] sm:$0xff]  }
 0x4d5   :  { %v1279_v48 = vpack.c.bf16 %v3271_v46, %v3268_v45  ;;  %v2911_v54 = vld [vmem:[#allocation10 + $0x18] sm:$0xff]  }
 0x4d7   :  { %1516 = vmatprep.mubr.bf16.mxu1 %v1279_v48  ;;  %1772 = vmatpush1.bf16.msra.mxu0 %v2853_v55  ;;  %v2898_v48 = vld [vmem:[#allocation7 + $0x6e0] ss:$8 sps:$4 sm:$0xff]   ;;  %v2912_v55 = vld [vmem:[#allocation10 + $0x60] sm:$0xff]  }
 0x4d8   :  { %1517 = vmatmul.mubr.bf16.vlgmr.msra.gmra.mrb[8].mxu1 %v1278_v49  ;;  %v2903_v49 = vld [vmem:[#allocation7 + $0x6f4] ss:$8 sps:$4 sm:$0xff]  }
 0x4d9   :  { %1999 = vmatpush1.bf16.msra.mxu1 %v2856_v57  ;;  %v2913_v57 = vld [vmem:[#allocation10 + $0x20] sm:$0xff]  }
 0x4da   :  { %2000 = vmatprep.subr.bf16.mxu1 %v2861_v60  ;;  %v1574_v60 = vrot.slane %v249_v59, %v3200_v56 }
 0x4dd   :  { %2001 = vmatpush1.bf16.msra.mxu1 %v2859_v61  ;;  %v1578_v61 = vrot.slane %v249_v59, %v3202_v58 }
 0x4de   :  { %2002 = vmatprep.subr.bf16.mxu1 %v2864_v62 }
 0x4e1   :  { %2003 = vmatpush1.bf16.msra.mxu1 %v2862_v63 }
 0x4e2   :  { %2004 = vmatprep.subr.bf16.mxu1 %v2867_v0 }
 0x4e5   :  { %2005 = vmatpush1.bf16.msra.mxu1 %v2865_v1 }
 0x4e6   :  { %2006 = vmatprep.subr.bf16.mxu1 %v2870_v2 }
 0x4e9   :  { %2007 = vmatpush1.bf16.msra.mxu1 %v2868_v3 }
 0x4ea   :  { %2008 = vmatprep.subr.bf16.mxu1 %v2873_v4 }
 0x4ed   :  { %2009 = vmatpush1.bf16.msra.mxu1 %v2871_v5 }
 0x4ee   :  { %2010 = vmatprep.subr.bf16.mxu1 %v2876_v6 }
 0x4f1   :  { %2011 = vmatpush1.bf16.msra.mxu1 %v2874_v7 }
 0x4f2   :  { %2012 = vmatprep.subr.bf16.mxu1 %v2879_v8 }
 0x4f5   :  { %2013 = vmatpush1.bf16.msra.mxu1 %v2877_v9 }
 0x4f6   :  { %2014 = vmatprep.subr.bf16.mxu1 %v2882_v10 }
 0x4f9   :  { %2015 = vmatpush1.bf16.msra.mxu1 %v2880_v11 }
 0x4fa   :  { %2016 = vmatprep.subr.bf16.mxu1 %v2885_v20 }
 0x4fd   :  { %2017 = vmatpush1.bf16.msra.mxu1 %v2883_v21 }
 0x4fe   :  { %2018 = vmatprep.subr.bf16.mxu1 %v2888_v14 }
 0x501   :  { %2019 = vmatpush1.bf16.msra.mxu1 %v2886_v15 }
 0x502   :  { %2020 = vmatprep.subr.bf16.mxu1 %v2891_v13  ;;  %v2914_v13 = vld [vmem:[#allocation10 + $0x68] sm:$0xff]  }
 0x505   :  { %2021 = vmatpush1.bf16.msra.mxu1 %v2889_v17  ;;  %v2915_v17 = vld [vmem:[#allocation10 + $0x28] sm:$0xff]  }
 0x506   :  { %2022 = vmatprep.subr.bf16.mxu1 %v2894_v16  ;;  %v2916_v16 = vld [vmem:[#allocation10 + $0x70] sm:$0xff]  }
 0x509   :  { %2023 = vmatpush1.bf16.msra.mxu1 %v2892_v18  ;;  %v2917_v18 = vld [vmem:[#allocation10 + $0x30] sm:$0xff]  }
 0x50a   :  { %2024 = vmatprep.subr.bf16.mxu1 %v2897_v41 }
 0x50d   :  { %2025 = vmatpush1.bf16.msra.mxu1 %v2895_v42  ;;  %v2491_v42 = vld [vmem:[%s3313_s5] ss:$0 sm:$0xff] }
 0x50e   :  { %2026 = vmatprep.subr.bf16.mxu1 %v2900_v43 }
 0x511   :  { %2027 = vmatpush1.bf16.msra.mxu1 %v2898_v48 }
 0x512   :  { %2028 = vmatprep.subr.bf16.mxu1 %v2903_v49 }
 0x5ab   :  { %v1518_v23 = vpop.f32.mrb[8].mxu1 }
 0x5ac   :  { %v1519_v24 = vadd.f32 %v1518_v23, %v1317_v19  ;;  %v1520_v25 = vpop.f32.mrb[9].mxu1 }
 0x5ad   :  { %v1521_v26 = vadd.f32 %v1520_v25, %v1321_v22  ;;  %v1522_v27 = vpop.f32.mrb[10].mxu1 }
 0x5ae   :  { %v1523_v28 = vadd.f32 %v1522_v27, %v1317_v19  ;;  %v1524_v29 = vpop.f32.mrb[11].mxu1  ;;  %v1527_v32 = vmax.f32 %v1519_v24, 0.0  ;;  %v2919_v19 = vld [vmem:[#allocation10 + $0x38] sm:$0xff]  }
 0x5af   :  { %v1528_v30 = vmax.f32 %v1521_v26, 0.0  ;;  %v1525_v31 = vadd.f32 %v1524_v29, %v1321_v22  ;;  %v250_v22 = vld [vmem:[#allocation8 + $0xc] sm:$0x3] }
 0x5b0   :  { %v1529_v33 = vmax.f32 %v1523_v28, 0.0  ;;  %v1531_v38 = vadd.f32 %v1527_v32, %v3274_v47  ;;  %v2907_v47 = vld [vmem:[#allocation10 + $0x8] sm:$0xff]   ;;  %v1831_v23 = vrot.slane %v250_v22, %v3200_v56  ;;  %v1835_v24 = vrot.slane %v250_v22, %v3202_v58 }
 0x5b1   :  { %v1530_v34 = vmax.f32 %v1525_v31, 0.0  ;;  %v1532_v36 = vadd.f32 %v1528_v30, %v3268_v45  ;;  %v2904_v45 = vld [vmem:[#allocation10 + $0x40] sm:$0xff]  }
 0x5b2   :  { %v1533_v35 = vadd.f32 %v1529_v33, %v3265_v44  ;;  %v2901_v44 = vld [vmem:[#allocation7 + $0x6f0] ss:$8 sps:$4 sm:$0xff]   ;;  %2508 = vmatprep.subr.bf16.mxu0 %v2904_v45 }
 0x5b3   :  { %v1534_v37 = vadd.f32 %v1530_v34, %v3271_v46  ;;  %2029 = vmatpush1.bf16.msra.mxu1 %v2901_v44  ;;  %v2905_v46 = vld [vmem:[#allocation10] sm:$0xff]  }
 0x5b4   :  { %v1535_v40 = vpack.c.bf16 %v1533_v35, %v1531_v38 }
 0x5b5   :  { %v1536_v39 = vpack.c.bf16 %v1534_v37, %v1532_v36 }
 0x5b7   :  { %1773 = vmatprep.mubr.bf16.mxu0 %v1536_v39 }
 0x5b8   :  { %1774 = vmatmul.mubr.bf16.vlgmr.msra.gmra.mrb[12].mxu0 %v1535_v40 }
 0x5b9   :  { %2509 = vmatpush3.bf16.msra.mxu0 %v2905_v46 }
 0x5ba   :  { %2510 = vmatprep.subr.bf16.mxu0 %v2906_v50 }
 0x5bd   :  { %2511 = vmatpush3.bf16.msra.mxu0 %v2907_v47 }
 0x5be   :  { %2512 = vmatprep.subr.bf16.mxu0 %v2908_v51 }
 0x5c1   :  { %2513 = vmatpush3.bf16.msra.mxu0 %v2909_v52 }
 0x5c2   :  { %2514 = vmatprep.subr.bf16.mxu0 %v2910_v53 }
 0x5c5   :  { %2515 = vmatpush3.bf16.msra.mxu0 %v2911_v54 }
 0x5c6   :  { %2516 = vmatprep.subr.bf16.mxu0 %v2912_v55 }
 0x5c9   :  { %2517 = vmatpush3.bf16.msra.mxu0 %v2913_v57 }
 0x5ca   :  { %2518 = vmatprep.subr.bf16.mxu0 %v2914_v13 }
 0x5cd   :  { %2519 = vmatpush3.bf16.msra.mxu0 %v2915_v17 }
 0x5ce   :  { %2520 = vmatprep.subr.bf16.mxu0 %v2916_v16 }
 0x5d1   :  { %2521 = vmatpush3.bf16.msra.mxu0 %v2917_v18 }
 0x5d2   :  { %2522 = vmatprep.subr.bf16.mxu0 %v2918_v12 }
 0x5d5   :  { %2523 = vmatpush3.bf16.msra.mxu0 %v2919_v19 }
 0x68b   :  { %v1775_v62 = vpop.f32.mrb[12].mxu0 }
 0x68c   :  { %v1776_v63 = vadd.f32 %v1775_v62, %v1574_v60  ;;  %v1777_v0 = vpop.f32.mrb[13].mxu0 }
 0x68d   :  { %v1778_v1 = vadd.f32 %v1777_v0, %v1578_v61  ;;  %v1779_v2 = vpop.f32.mrb[14].mxu0 }
 0x68e   :  { %v1780_v3 = vadd.f32 %v1779_v2, %v1574_v60  ;;  %v1781_v4 = vpop.f32.mrb[15].mxu0  ;;  %v1784_v7 = vmax.f32 %v1776_v63, 0.0 }
 0x68f   :  { %v1785_v5 = vmax.f32 %v1778_v1, 0.0  ;;  %v1782_v6 = vadd.f32 %v1781_v4, %v1578_v61 }
 0x690   :  { %v1786_v8 = vmax.f32 %v1780_v3, 0.0  ;;  %v1788_v21 = vadd.f32 %v1784_v7, %v1531_v38 }
 0x691   :  { %v1787_v9 = vmax.f32 %v1782_v6, 0.0  ;;  %v1789_v11 = vadd.f32 %v1785_v5, %v1532_v36 }
 0x692   :  { %v1790_v10 = vadd.f32 %v1786_v8, %v1533_v35 }
 0x693   :  { %v1791_v20 = vadd.f32 %v1787_v9, %v1534_v37 }
 0x694   :  { %v1792_v15 = vpack.c.bf16 %v1790_v10, %v1788_v21 }
 0x695   :  { %v1793_v14 = vpack.c.bf16 %v1791_v20, %v1789_v11 }
 0x697   :  { %2030 = vmatprep.mubr.bf16.mxu1 %v1793_v14 }
 0x698   :  { %2031 = vmatmul.mubr.bf16.vlgmr.msra.gmra.mrb[12].mxu1 %v1792_v15 }
 0x76b   :  { %v2032_v25 = vpop.f32.mrb[12].mxu1 }
 0x76c   :  { %v2033_v26 = vadd.f32 %v2032_v25, %v1831_v23  ;;  %v2034_v27 = vpop.f32.mrb[13].mxu1 }
 0x76d   :  { %v2035_v28 = vadd.f32 %v2034_v27, %v1835_v24  ;;  %v2036_v29 = vpop.f32.mrb[14].mxu1 }
 0x76e   :  { %v2041_v30 = vmax.f32 %v2033_v26, 0.0  ;;  %v2037_v31 = vadd.f32 %v2036_v29, %v1831_v23  ;;  %v2038_v32 = vpop.f32.mrb[15].mxu1 }
 0x76f   :  { %v2042_v33 = vmax.f32 %v2035_v28, 0.0  ;;  %v2039_v34 = vadd.f32 %v2038_v32, %v1835_v24 }
 0x770   :  { %v2043_v35 = vmax.f32 %v2037_v31, 0.0  ;;  %v2045_v37 = vadd.f32 %v2041_v30, %v1788_v21 }
 0x771   :  { %v2044_v36 = vmax.f32 %v2039_v34, 0.0  ;;  %v2046_v39 = vadd.f32 %v2042_v33, %v1789_v11 }
 0x772   :  { %v2047_v38 = vadd.f32 %v2043_v35, %v1790_v10 }
 0x773   :  { %v2048_v40 = vadd.f32 %v2044_v36, %v1791_v20 }
 0x774   :  { %v2049_v41 = vpack.c.bf16 %v2047_v38, %v2045_v37 }
 0x775   :  { %v2050_v56 = vpack.c.bf16 %v2048_v40, %v2046_v39 }
 0x777   :  { %2218 = vmatprep.mubr.bf16.mxu0 %v2050_v56 }
 0x778   :  { %2219 = vmatmul.mubr.bf16.vlgmr.msra.gmra.mrb[16].mxu0 %v2049_v41 }
 0x84b   :  { %v2524_v58 = vpop.f32.mrb[16].mxu0 }
 0x84c   :  { %v2525_v43 = vpop.f32.mrb[17].mxu0 }
 0x84d   :  { %v2526_v48 = vadd.f32 %v2525_v43, %v2524_v58  ;;  %v2527_v49 = vpop.f32.mrb[18].mxu0 }
 0x84e   :  { %v2528_v44 = vpop.f32.mrb[19].mxu0 }
 0x84f   :  { %v2221_v45 = vadd.f32 %v2526_v48, %v2491_v42  ;;  %v2529_v46 = vadd.f32 %v2528_v44, %v2527_v49 }
 0x851   :  { %v2227_v50 = vmax.f32 %v2221_v45, 0.0  ;;  %v2224_v47 = vadd.f32 %v2529_v46, %v2491_v42 }
 0x853   :  { %2229 = vst [vmem:[#allocation11] sm:$0xff] %v2227_v50  ;;  %v2228_v51 = vmax.f32 %v2224_v47, 0.0 }
 0x855   :  { %2230 = vst [vmem:[#allocation11 + $0x8] sm:$0xff] %v2228_v51 }
 0x856   :  { %3041 = shalt.err (!%p3038_p2)
}
 0x857   :  { %s3042_s18 = scalar_lea.hbm %s3314_s6, 256 }
 0x858   :  { %p3043_p3 = scmp.ne.s32.totalorder %s3314_s6, %s3042_s18  ;;  %p3046_p4 = scmp.lt.u32.totalorder %s3042_s18, %s3314_s6 }
 0x85a   :  { %p3048_p5 = pnand %p3046_p4, %p3043_p3 }
 0x85c   :  { %3051 = shalt.err (!%p3048_p5)
}
 0x85d   :  { %2242 = dma.vmem_to_hbm [thread:$0]  %s2237_s15, 256, %s3314_s6, [#allocation4], %s3061_s7, %s3061_s7, %s3062_s8  }
 0x85e   :  { %3058 = dma.done.wait [#allocation4], 256  }
 0x85f   :  { %3059 = vsyncadd [#allocation4], 4294967040 }
 0x860   :  { %2246 = vsyncpa [#allocation3], 1 }
 0x861   :  { %2247 = vsyncpa [#allocation6], 1 }
 0x862   :  { %2248 = vsyncpa [#allocation9], 1 }
 0x863   :  { %2249 = vsyncpa [#allocation4], 1 }

</bundles_post_ra>
